<compile_context>
chip_gen: v7x
topology: tpu7x:2x2x1
jax: 0.10.0
libtpu: 0.0.40
codegen_flags: <defaults>
</compile_context>

<pallas_src>
from functools import partial

import numpy as np
import jax
import jax.numpy as jnp
from jax.experimental import pallas as pl
from jax.experimental.pallas import tpu as pltpu


# ----------------------------------------------------------------------------
# Kernel 1: BSConvU = pointwise 1x1 (no bias) -> depthwise 3x3 (bias), pad=1,
#           optional residual add on the INPUT (matches x1+x pattern in CFB),
#           optional LeakyReLU(0.2).  Flat (HW, C) in / flat (HW, Cout) out.
# ----------------------------------------------------------------------------
def _bsconv_kernel(*refs, H, W, act, has_res):
    if has_res:
        x_ref, r_ref, wpw_ref, wdw_ref, b_ref, o_ref, pad_ref = refs
    else:
        x_ref, wpw_ref, wdw_ref, b_ref, o_ref, pad_ref = refs
        r_ref = None
    Cout = wpw_ref.shape[1]

    # optional residual add (f32) then bf16 for the MXU
    xin = x_ref[0]                                           # (HW, Cin) bf16
    if has_res:
        xin = (xin.astype(jnp.float32)
               + r_ref[0].astype(jnp.float32)).astype(jnp.bfloat16)

    # pointwise 1x1: ONE big MXU matmul over all pixels (M = H*W)
    p = jnp.dot(xin, wpw_ref[...],
                preferred_element_type=jnp.float32)          # (HW, Cout) f32

    # zero ONLY the 1-pixel halo (interior is fully overwritten every step, so
    # this is safe under "parallel" grid semantics and avoids a full zero-fill)
    pad_ref[0:1, :, :] = jnp.zeros((1, W + 2, Cout), jnp.float32)
    pad_ref[H + 1:H + 2, :, :] = jnp.zeros((1, W + 2, Cout), jnp.float32)
    pad_ref[1:H + 1, 0:1, :] = jnp.zeros((H, 1, Cout), jnp.float32)
    pad_ref[1:H + 1, W + 1:W + 2, :] = jnp.zeros((H, 1, Cout), jnp.float32)
    # single block store of the pointwise output into the padded interior
    pad_ref[1:H + 1, 1:W + 1, :] = p.reshape(H, W, Cout)

    # depthwise 3x3: 3 band loads + 9 whole-plane FMAs on the VPU
    # TODO(synk): round the scratch W axis up to 8 sublanes / use roll-based
    # shifts so the dx taps stay tile-aligned at production sizes.
    wdw = wdw_ref[...].astype(jnp.float32)                   # (9, Cout)
    bias = b_ref[...].astype(jnp.float32).reshape(1, 1, Cout)
    acc = jnp.zeros((H, W, Cout), jnp.float32) + bias
    for dy in range(3):
        band = pad_ref[dy:dy + H, :, :]                      # (H, W+2, Cout)
        for dx in range(3):
            k = dy * 3 + dx
            tap = band[:, dx:dx + W, :]                      # (H, W, Cout)
            acc = acc + tap * wdw[k:k + 1, :].reshape(1, 1, Cout)
    if act:
        acc = jnp.maximum(acc, 0.2 * acc)                    # LeakyReLU(0.2)
    o_ref[0] = acc.reshape(H * W, Cout).astype(o_ref.dtype)  # flat lane-dense


def bsconv_pallas(x_flat, res_flat, p, *, H, W, act):
    """x_flat/res_flat: (B, H*W, Cin) bf16.  Returns (B, H*W, Cout) bf16."""
    B, HW, Cin = x_flat.shape
    Cout = p["pw"].shape[1]
    has_res = res_flat is not None
    kern = partial(_bsconv_kernel, H=H, W=W, act=act, has_res=has_res)

    flat_spec = pl.BlockSpec((1, HW, Cin), lambda i: (i, 0, 0))
    in_specs = [flat_spec] + ([flat_spec] if has_res else []) + [
        pl.BlockSpec((Cin, Cout), lambda i: (0, 0)),
        pl.BlockSpec((9, Cout), lambda i: (0, 0)),
        pl.BlockSpec((1, Cout), lambda i: (0, 0)),
    ]
    args = (x_flat, res_flat) if has_res else (x_flat,)
    return pl.pallas_call(
        kern,
        out_shape=jax.ShapeDtypeStruct((B, HW, Cout), jnp.bfloat16),
        grid=(B,),
        in_specs=in_specs,
        out_specs=pl.BlockSpec((1, HW, Cout), lambda i: (i, 0, 0)),
        scratch_shapes=[pltpu.VMEM((H + 2, W + 2, Cout), jnp.float32)],
        compiler_params=pltpu.CompilerParams(dimension_semantics=("parallel",)),
    )(*args, p["pw"], p["dw"], p["b"])


# ----------------------------------------------------------------------------
# Kernel 2: fusion Linear(3C->C) (split weights -> no concat) + residual x
#           + collapse Linear(C->f) + MaxPool2d(4,4), all fused.  The pool is
#           computed from the in-register collapse output (no ref read-back).
# ----------------------------------------------------------------------------
def _fuse_collapse_pool_kernel(x1_ref, x2_ref, x3_ref, x_ref,
                               w1_ref, w2_ref, w3_ref, fb_ref,
                               cw_ref, cb_ref,
                               fused_ref, y_ref, pool_ref, *, H, W):
    F = cw_ref.shape[1]
    Ho, Wo = H // 4, W // 4

    # fusion Linear(3C -> C) as three (C, C) matmuls into one f32 accumulator
    acc = jnp.dot(x1_ref[0], w1_ref[...], preferred_element_type=jnp.float32)
    acc = acc + jnp.dot(x2_ref[0], w2_ref[...], preferred_element_type=jnp.float32)
    acc = acc + jnp.dot(x3_ref[0], w3_ref[...], preferred_element_type=jnp.float32)
    fused = acc + fb_ref[...] + x_ref[0].astype(jnp.float32)        # (HW, C)
    fused_ref[0] = fused.astype(fused_ref.dtype)

    # collapse Linear(C -> f) while `fused` is still resident in VMEM
    y = jnp.dot(fused.astype(jnp.bfloat16), cw_ref[...],
                preferred_element_type=jnp.float32) + cb_ref[...]   # (HW, f)
    y_ref[0] = y.astype(y_ref.dtype)                                # one store

    # MaxPool2d(4, 4) from the in-register value: reduce H then W via
    # reshape + max (no strided ref reads, no VMEM round trip)
    ysp = y.reshape(H, W, F)
    rm = jnp.max(ysp.reshape(Ho, 4, W, F), axis=1)                  # (Ho, W, F)
    pooled = jnp.max(rm.reshape(Ho, Wo, 4, F), axis=2)              # (Ho, Wo, F)
    pool_ref[0] = pooled.reshape(Ho * Wo, F).astype(pool_ref.dtype)


def fuse_collapse_pool_pallas(x1f, x2f, x3f, xf, params, *, H, W):
    B, HW, C = x1f.shape
    F = params["collapse_w"].shape[1]
    Ho, Wo = H // 4, W // 4
    kern = partial(_fuse_collapse_pool_kernel, H=H, W=W)
    flat_spec = pl.BlockSpec((1, HW, C), lambda i: (i, 0, 0))
    return pl.pallas_call(
        kern,
        out_shape=(
            jax.ShapeDtypeStruct((B, HW, C), jnp.bfloat16),          # fused
            jax.ShapeDtypeStruct((B, HW, F), jnp.bfloat16),          # collapse y
            jax.ShapeDtypeStruct((B, Ho * Wo, F), jnp.bfloat16),     # maxpool(y)
        ),
        grid=(B,),
        in_specs=[flat_spec, flat_spec, flat_spec, flat_spec,
                  pl.BlockSpec((C, C), lambda i: (0, 0)),
                  pl.BlockSpec((C, C), lambda i: (0, 0)),
                  pl.BlockSpec((C, C), lambda i: (0, 0)),
                  pl.BlockSpec((1, C), lambda i: (0, 0)),
                  pl.BlockSpec((C, F), lambda i: (0, 0)),
                  pl.BlockSpec((1, F), lambda i: (0, 0))],
        out_specs=(pl.BlockSpec((1, HW, C), lambda i: (i, 0, 0)),
                   pl.BlockSpec((1, HW, F), lambda i: (i, 0, 0)),
                   pl.BlockSpec((1, Ho * Wo, F), lambda i: (i, 0, 0))),
        compiler_params=pltpu.CompilerParams(dimension_semantics=("parallel",)),
    )(x1f, x2f, x3f, xf,
      params["fusion_w1"], params["fusion_w2"], params["fusion_w3"],
      params["fusion_b"], params["collapse_w"], params["collapse_b"])


# ----------------------------------------------------------------------------
# Kernel 3: LPA tail = bilinear 4x upsample (align_corners=False; columns via
#           Wo FMAs on the SMALL pooled map, rows via one MXU matmul)
#           + restore Linear(f->C) + exact sigmoid gate on `fused`.
# ----------------------------------------------------------------------------
def _lpa_tail_kernel(yc_ref, yres_ref, fused_ref, my_ref, mx_ref,
                     rw_ref, rb_ref, o_ref, *, H, W, Ho, Wo):
    F = yc_ref.shape[-1]
    yc = yc_ref[0].astype(jnp.float32)            # (Ho, Wo, F)
    mx = mx_ref[...]                              # (W, Wo)  f32

    # column (W) upsample first, while the plane is still small: Wo plane FMAs
    # TODO(synk): exploit the 4-phase / 2-tap bilinear structure (8 FMAs total)
    # for production Wo sizes.
    t = jnp.zeros((Ho, W, F), jnp.float32)
    for wo in range(Wo):
        t = t + mx[:, wo:wo + 1].reshape(1, W, 1) * yc[:, wo:wo + 1, :]

    # row (H) upsample as ONE MXU matmul: (H, Ho) @ (Ho, W*F)
    yup = jnp.dot(my_ref[...].astype(jnp.bfloat16),
                  t.reshape(Ho, W * F).astype(jnp.bfloat16),
                  preferred_element_type=jnp.float32).reshape(H * W, F)

    # + full-resolution residual (collapse output), then restore Linear(f->C)
    z = yup + yres_ref[0].astype(jnp.float32)                         # (HW, F)
    logits = jnp.dot(z.astype(jnp.bfloat16), rw_ref[...],
                     preferred_element_type=jnp.float32) + rb_ref[...]  # (HW, C)

    # exact sigmoid via tanh (single EUP op), then gate `fused`
    gate = 0.5 * jnp.tanh(0.5 * logits) + 0.5
    o_ref[0] = (fused_ref[0].astype(jnp.float32) * gate).astype(o_ref.dtype)


def lpa_tail_pallas(yc_sp, y_flat, fused_flat, My, Mx, rw, rb, *, H, W):
    B, Ho, Wo, F = yc_sp.shape
    HW = H * W
    C = rw.shape[1]
    kern = partial(_lpa_tail_kernel, H=H, W=W, Ho=Ho, Wo=Wo)
    return pl.pallas_call(
        kern,
        out_shape=jax.ShapeDtypeStruct((B, HW, C), jnp.float32),
        grid=(B,),
        in_specs=[pl.BlockSpec((1, Ho, Wo, F), lambda i: (i, 0, 0, 0)),
                  pl.BlockSpec((1, HW, F), lambda i: (i, 0, 0)),
                  pl.BlockSpec((1, HW, C), lambda i: (i, 0, 0)),
                  pl.BlockSpec((H, Ho), lambda i: (0, 0)),
                  pl.BlockSpec((W, Wo), lambda i: (0, 0)),
                  pl.BlockSpec((F, C), lambda i: (0, 0)),
                  pl.BlockSpec((1, C), lambda i: (0, 0))],
        out_specs=pl.BlockSpec((1, HW, C), lambda i: (i, 0, 0)),
        compiler_params=pltpu.CompilerParams(dimension_semantics=("parallel",)),
    )(yc_sp, y_flat, fused_flat, My, Mx, rw, rb)


# ----------------------------------------------------------------------------
# Host-side glue (free XLA reshapes only; no pads / concats / big transposes)
# ----------------------------------------------------------------------------
def interp_matrix(out_size, in_size):
    """PyTorch F.interpolate(mode='bilinear', align_corners=False) weights."""
    M = np.zeros((out_size, in_size), dtype=np.float32)
    scale = in_size / out_size
    for o in range(out_size):
        src = max((o + 0.5) * scale - 0.5, 0.0)
        i0 = min(int(np.floor(src)), in_size - 1)
        i1 = min(i0 + 1, in_size - 1)
        l1 = src - i0
        M[o, i0] += 1.0 - l1
        M[o, i1] += l1
    return jnp.asarray(M)


def cfb_forward(x, params, My, Mx):
    """x: (B, H, W, C) NHWC float32."""
    B, H, W, C = x.shape
    assert H % 4 == 0 and W % 4 == 0 and C % 4 == 0
    F = C // 4
    Ho, Wo = H // 4, W // 4
    HW = H * W

    x_flat = x.astype(jnp.bfloat16).reshape(B, HW, C)

    # trunk of three BSConvU + LeakyReLU (residual add fused into the kernel)
    x1 = bsconv_pallas(x_flat, None, params["conv1"], H=H, W=W, act=True)
    x2 = bsconv_pallas(x1, x_flat, params["conv2"], H=H, W=W, act=True)
    x3 = bsconv_pallas(x2, x_flat, params["conv3"], H=H, W=W, act=True)

    # fusion(3C->C) + residual + collapse(C->f) + MaxPool2d(4,4), one kernel
    fused_flat, y_flat, y_pool = fuse_collapse_pool_pallas(
        x1, x2, x3, x_flat, params, H=H, W=W)

    # LPA redistribution BSConvU on the pooled map (no activation)
    yc = bsconv_pallas(y_pool, None, params["redis"], H=Ho, W=Wo, act=False)
    yc_sp = yc.reshape(B, Ho, Wo, F)

    # upsample + restore + sigmoid gate, one kernel
    out_flat = lpa_tail_pallas(yc_sp, y_flat, fused_flat, My, Mx,
                               params["restore_w"], params["restore_b"],
                               H=H, W=W)
    return out_flat.reshape(B, H, W, C)


def init_params(key, n_feats):
    f = n_feats // 4
    keys = jax.random.split(key, 18)
    bf = jnp.bfloat16

    def w(k, shape, scale=0.1, dtype=jnp.float32):
        return (scale * jax.random.normal(k, shape)).astype(dtype)

    params = {}
    for i, name in enumerate(["conv1", "conv2", "conv3"]):
        params[name] = {
            "pw": w(keys[3 * i + 0], (n_feats, n_feats), dtype=bf),  # (Cin, Cout)
            "dw": w(keys[3 * i + 1], (9, n_feats)),                  # f32 (VPU)
            "b":  w(keys[3 * i + 2], (1, n_feats)),                  # f32
        }
    fusion_w = w(keys[9], (3 * n_feats, n_feats), dtype=bf)
    params["fusion_w1"] = fusion_w[0 * n_feats:1 * n_feats]
    params["fusion_w2"] = fusion_w[1 * n_feats:2 * n_feats]
    params["fusion_w3"] = fusion_w[2 * n_feats:3 * n_feats]
    params["fusion_b"] = w(keys[10], (1, n_feats))
    params["collapse_w"] = w(keys[11], (n_feats, f), dtype=bf)
    params["collapse_b"] = w(keys[12], (1, f))
    params["redis"] = {
        "pw": w(keys[13], (f, f), dtype=bf),
        "dw": w(keys[14], (9, f)),
        "b":  w(keys[15], (1, f)),
    }
    params["restore_w"] = w(keys[16], (f, n_feats), dtype=bf)
    params["restore_b"] = w(keys[17], (1, n_feats))
    return params


if __name__ == "__main__":
    key = jax.random.PRNGKey(0)
    kx, kp = jax.random.split(key)

    B, C, H, W = 2, 16, 16, 16          # n_feats=16 (div by 4), H,W div by 4
    x_nchw = jax.random.normal(kx, (B, C, H, W), dtype=jnp.float32)
    x_nhwc = jnp.transpose(x_nchw, (0, 2, 3, 1))     # kernels run in NHWC

    params = init_params(kp, C)

    # hoisted bilinear-interp matrices (constants of the forward pass)
    Ho, Wo = H // 4, W // 4
    My = interp_matrix(H, Ho)                        # (H, Ho) row weights
    Mx = interp_matrix(W, Wo)                        # (W, Wo) column weights

    out_nhwc = cfb_forward(x_nhwc, params, My, Mx)
    out_nhwc = jax.block_until_ready(out_nhwc)
    out_nchw = jnp.transpose(out_nhwc, (0, 3, 1, 2))
    assert out_nchw.shape == (B, C, H, W)
    assert bool(jnp.all(jnp.isfinite(out_nchw)))
    print("KERNEL_OK")
</pallas_src>

<mosaic_0001>
module attributes {stable_mosaic.version = 11 : i64} {
  func.func @_bsconv_kernel(%arg0: i32, %arg1: memref<1x256x16xbf16, #tpu.memory_space<vmem>>, %arg2: memref<16x16xbf16, #tpu.memory_space<vmem>>, %arg3: memref<9x16xf32, #tpu.memory_space<vmem>>, %arg4: memref<1x16xf32, #tpu.memory_space<vmem>>, %arg5: memref<1x256x16xbf16, #tpu.memory_space<vmem>>, %arg6: memref<18x18x16xf32, #tpu.memory_space<vmem>>) attributes {dimension_semantics = [#tpu.dimension_semantics<parallel>], iteration_bounds = array<i64: 2>, scalar_prefetch = 0 : i64, scratch_operands = 1 : i64, tpu.core_type = #tpu.core_type<tc>, window_params = [{transform_indices = @transform_0, window_bounds = array<i64: 1, 256, 16>}, {pipeline_mode = #tpu.pipeline_mode<synchronous>, transform_indices = @transform_1, window_bounds = array<i64: 16, 16>}, {pipeline_mode = #tpu.pipeline_mode<synchronous>, transform_indices = @transform_2, window_bounds = array<i64: 9, 16>}, {pipeline_mode = #tpu.pipeline_mode<synchronous>, transform_indices = @transform_3, window_bounds = array<i64: 1, 16>}, {transform_indices = @transform_4, window_bounds = array<i64: 1, 256, 16>}]} {
    %c0 = arith.constant 0 : index
    %c0_0 = arith.constant 0 : index
    %c0_1 = arith.constant 0 : index
    %0 = vector.load %arg1[%c0, %c0_0, %c0_1] : memref<1x256x16xbf16, #tpu.memory_space<vmem>>, vector<1x256x16xbf16>
    %1 = vector.shape_cast %0 : vector<1x256x16xbf16> to vector<256x16xbf16>
    %c0_2 = arith.constant 0 : index
    %c0_3 = arith.constant 0 : index
    %2 = vector.load %arg2[%c0_2, %c0_3] : memref<16x16xbf16, #tpu.memory_space<vmem>>, vector<16x16xbf16>
    %cst = arith.constant dense<0.000000e+00> : vector<256x16xf32>
    %3 = tpu.matmul %1, %2, %cst {dimension_numbers = #tpu.dot_dimension_numbers<[1], [0], [0], [1], [0, 0, 1, 1], [], []>} : vector<256x16xbf16>, vector<16x16xbf16>, vector<256x16xf32> -> vector<256x16xf32>
    %cst_4 = arith.constant 0.000000e+00 : f32
    %4 = vector.broadcast %cst_4 : f32 to vector<1x18x16xf32>
    %c0_5 = arith.constant 0 : index
    %c0_6 = arith.constant 0 : index
    %c0_7 = arith.constant 0 : index
    %5 = vector.load %arg6[%c0_5, %c0_6, %c0_7] : memref<18x18x16xf32, #tpu.memory_space<vmem>>, vector<1x18x16xf32>
    tpu.vector_store %arg6[%c0_5, %c0_6, %c0_7], %4 {strides = array<i32>} : memref<18x18x16xf32, #tpu.memory_space<vmem>>, vector<1x18x16xf32>,
    %cst_8 = arith.constant 0.000000e+00 : f32
    %6 = vector.broadcast %cst_8 : f32 to vector<1x18x16xf32>
    %c17 = arith.constant 17 : index
    %c0_9 = arith.constant 0 : index
    %c0_10 = arith.constant 0 : index
    %7 = vector.load %arg6[%c17, %c0_9, %c0_10] : memref<18x18x16xf32, #tpu.memory_space<vmem>>, vector<1x18x16xf32>
    tpu.vector_store %arg6[%c17, %c0_9, %c0_10], %6 {strides = array<i32>} : memref<18x18x16xf32, #tpu.memory_space<vmem>>, vector<1x18x16xf32>,
    %cst_11 = arith.constant 0.000000e+00 : f32
    %8 = vector.broadcast %cst_11 : f32 to vector<16x1x16xf32>
    %c1 = arith.constant 1 : index
    %c0_12 = arith.constant 0 : index
    %c0_13 = arith.constant 0 : index
    %9 = vector.load %arg6[%c1, %c0_12, %c0_13] : memref<18x18x16xf32, #tpu.memory_space<vmem>>, vector<16x1x16xf32>
    tpu.vector_store %arg6[%c1, %c0_12, %c0_13], %8 {strides = array<i32>} : memref<18x18x16xf32, #tpu.memory_space<vmem>>, vector<16x1x16xf32>,
    %cst_14 = arith.constant 0.000000e+00 : f32
    %10 = vector.broadcast %cst_14 : f32 to vector<16x1x16xf32>
    %c1_15 = arith.constant 1 : index
    %c17_16 = arith.constant 17 : index
    %c0_17 = arith.constant 0 : index
    %11 = vector.load %arg6[%c1_15, %c17_16, %c0_17] : memref<18x18x16xf32, #tpu.memory_space<vmem>>, vector<16x1x16xf32>
    tpu.vector_store %arg6[%c1_15, %c17_16, %c0_17], %10 {strides = array<i32>} : memref<18x18x16xf32, #tpu.memory_space<vmem>>, vector<16x1x16xf32>,
    %12 = vector.shape_cast %3 : vector<256x16xf32> to vector<16x16x16xf32>
    %c1_18 = arith.constant 1 : index
    %c1_19 = arith.constant 1 : index
    %c0_20 = arith.constant 0 : index
    %13 = vector.load %arg6[%c1_18, %c1_19, %c0_20] : memref<18x18x16xf32, #tpu.memory_space<vmem>>, vector<16x16x16xf32>
    tpu.vector_store %arg6[%c1_18, %c1_19, %c0_20], %12 {strides = array<i32>} : memref<18x18x16xf32, #tpu.memory_space<vmem>>, vector<16x16x16xf32>,
    %c0_21 = arith.constant 0 : index
    %c0_22 = arith.constant 0 : index
    %14 = vector.load %arg3[%c0_21, %c0_22] : memref<9x16xf32, #tpu.memory_space<vmem>>, vector<9x16xf32>
    %c0_23 = arith.constant 0 : index
    %c0_24 = arith.constant 0 : index
    %15 = vector.load %arg4[%c0_23, %c0_24] : memref<1x16xf32, #tpu.memory_space<vmem>>, vector<1x16xf32>
    %16 = vector.shape_cast %15 : vector<1x16xf32> to vector<1x1x16xf32>
    %cst_25 = arith.constant 0.000000e+00 : f32
    %17 = vector.broadcast %cst_25 : f32 to vector<16x16x16xf32>
    %18 = vector.broadcast %16 : vector<1x1x16xf32> to vector<16x16x16xf32>
    %19 = arith.addf %17, %18 : vector<16x16x16xf32>
    %c0_26 = arith.constant 0 : index
    %c0_27 = arith.constant 0 : index
    %c0_28 = arith.constant 0 : index
    %20 = vector.load %arg6[%c0_26, %c0_27, %c0_28] : memref<18x18x16xf32, #tpu.memory_space<vmem>>, vector<16x18x16xf32>
    %21 = vector.extract_strided_slice %20 {offsets = [0, 0, 0], sizes = [16, 16, 16], strides = [1, 1, 1]} : vector<16x18x16xf32> to vector<16x16x16xf32>
    %22 = vector.extract_strided_slice %14 {offsets = [0, 0], sizes = [1, 16], strides = [1, 1]} : vector<9x16xf32> to vector<1x16xf32>
    %23 = vector.shape_cast %22 : vector<1x16xf32> to vector<1x1x16xf32>
    %24 = vector.broadcast %23 : vector<1x1x16xf32> to vector<16x16x16xf32>
    %25 = arith.mulf %21, %24 : vector<16x16x16xf32>
    %26 = arith.addf %19, %25 : vector<16x16x16xf32>
    %27 = vector.extract_strided_slice %20 {offsets = [0, 1, 0], sizes = [16, 16, 16], strides = [1, 1, 1]} : vector<16x18x16xf32> to vector<16x16x16xf32>
    %28 = vector.extract_strided_slice %14 {offsets = [1, 0], sizes = [1, 16], strides = [1, 1]} : vector<9x16xf32> to vector<1x16xf32>
    %29 = vector.shape_cast %28 : vector<1x16xf32> to vector<1x1x16xf32>
    %30 = vector.broadcast %29 : vector<1x1x16xf32> to vector<16x16x16xf32>
    %31 = arith.mulf %27, %30 : vector<16x16x16xf32>
    %32 = arith.addf %26, %31 : vector<16x16x16xf32>
    %33 = vector.extract_strided_slice %20 {offsets = [0, 2, 0], sizes = [16, 16, 16], strides = [1, 1, 1]} : vector<16x18x16xf32> to vector<16x16x16xf32>
    %34 = vector.extract_strided_slice %14 {offsets = [2, 0], sizes = [1, 16], strides = [1, 1]} : vector<9x16xf32> to vector<1x16xf32>
    %35 = vector.shape_cast %34 : vector<1x16xf32> to vector<1x1x16xf32>
    %36 = vector.broadcast %35 : vector<1x1x16xf32> to vector<16x16x16xf32>
    %37 = arith.mulf %33, %36 : vector<16x16x16xf32>
    %38 = arith.addf %32, %37 : vector<16x16x16xf32>
    %c1_29 = arith.constant 1 : index
    %c0_30 = arith.constant 0 : index
    %c0_31 = arith.constant 0 : index
    %39 = vector.load %arg6[%c1_29, %c0_30, %c0_31] : memref<18x18x16xf32, #tpu.memory_space<vmem>>, vector<16x18x16xf32>
    %40 = vector.extract_strided_slice %39 {offsets = [0, 0, 0], sizes = [16, 16, 16], strides = [1, 1, 1]} : vector<16x18x16xf32> to vector<16x16x16xf32>
    %41 = vector.extract_strided_slice %14 {offsets = [3, 0], sizes = [1, 16], strides = [1, 1]} : vector<9x16xf32> to vector<1x16xf32>
    %42 = vector.shape_cast %41 : vector<1x16xf32> to vector<1x1x16xf32>
    %43 = vector.broadcast %42 : vector<1x1x16xf32> to vector<16x16x16xf32>
    %44 = arith.mulf %40, %43 : vector<16x16x16xf32>
    %45 = arith.addf %38, %44 : vector<16x16x16xf32>
    %46 = vector.extract_strided_slice %39 {offsets = [0, 1, 0], sizes = [16, 16, 16], strides = [1, 1, 1]} : vector<16x18x16xf32> to vector<16x16x16xf32>
    %47 = vector.extract_strided_slice %14 {offsets = [4, 0], sizes = [1, 16], strides = [1, 1]} : vector<9x16xf32> to vector<1x16xf32>
    %48 = vector.shape_cast %47 : vector<1x16xf32> to vector<1x1x16xf32>
    %49 = vector.broadcast %48 : vector<1x1x16xf32> to vector<16x16x16xf32>
    %50 = arith.mulf %46, %49 : vector<16x16x16xf32>
    %51 = arith.addf %45, %50 : vector<16x16x16xf32>
    %52 = vector.extract_strided_slice %39 {offsets = [0, 2, 0], sizes = [16, 16, 16], strides = [1, 1, 1]} : vector<16x18x16xf32> to vector<16x16x16xf32>
    %53 = vector.extract_strided_slice %14 {offsets = [5, 0], sizes = [1, 16], strides = [1, 1]} : vector<9x16xf32> to vector<1x16xf32>
    %54 = vector.shape_cast %53 : vector<1x16xf32> to vector<1x1x16xf32>
    %55 = vector.broadcast %54 : vector<1x1x16xf32> to vector<16x16x16xf32>
    %56 = arith.mulf %52, %55 : vector<16x16x16xf32>
    %57 = arith.addf %51, %56 : vector<16x16x16xf32>
    %c2 = arith.constant 2 : index
    %c0_32 = arith.constant 0 : index
    %c0_33 = arith.constant 0 : index
    %58 = vector.load %arg6[%c2, %c0_32, %c0_33] : memref<18x18x16xf32, #tpu.memory_space<vmem>>, vector<16x18x16xf32>
    %59 = vector.extract_strided_slice %58 {offsets = [0, 0, 0], sizes = [16, 16, 16], strides = [1, 1, 1]} : vector<16x18x16xf32> to vector<16x16x16xf32>
    %60 = vector.extract_strided_slice %14 {offsets = [6, 0], sizes = [1, 16], strides = [1, 1]} : vector<9x16xf32> to vector<1x16xf32>
    %61 = vector.shape_cast %60 : vector<1x16xf32> to vector<1x1x16xf32>
    %62 = vector.broadcast %61 : vector<1x1x16xf32> to vector<16x16x16xf32>
    %63 = arith.mulf %59, %62 : vector<16x16x16xf32>
    %64 = arith.addf %57, %63 : vector<16x16x16xf32>
    %65 = vector.extract_strided_slice %58 {offsets = [0, 1, 0], sizes = [16, 16, 16], strides = [1, 1, 1]} : vector<16x18x16xf32> to vector<16x16x16xf32>
    %66 = vector.extract_strided_slice %14 {offsets = [7, 0], sizes = [1, 16], strides = [1, 1]} : vector<9x16xf32> to vector<1x16xf32>
    %67 = vector.shape_cast %66 : vector<1x16xf32> to vector<1x1x16xf32>
    %68 = vector.broadcast %67 : vector<1x1x16xf32> to vector<16x16x16xf32>
    %69 = arith.mulf %65, %68 : vector<16x16x16xf32>
    %70 = arith.addf %64, %69 : vector<16x16x16xf32>
    %71 = vector.extract_strided_slice %58 {offsets = [0, 2, 0], sizes = [16, 16, 16], strides = [1, 1, 1]} : vector<16x18x16xf32> to vector<16x16x16xf32>
    %72 = vector.extract_strided_slice %14 {offsets = [8, 0], sizes = [1, 16], strides = [1, 1]} : vector<9x16xf32> to vector<1x16xf32>
    %73 = vector.shape_cast %72 : vector<1x16xf32> to vector<1x1x16xf32>
    %74 = vector.broadcast %73 : vector<1x1x16xf32> to vector<16x16x16xf32>
    %75 = arith.mulf %71, %74 : vector<16x16x16xf32>
    %76 = arith.addf %70, %75 : vector<16x16x16xf32>
    %cst_34 = arith.constant 2.000000e-01 : f32
    %77 = vector.broadcast %cst_34 : f32 to vector<16x16x16xf32>
    %78 = arith.mulf %77, %76 : vector<16x16x16xf32>
    %79 = arith.maximumf %76, %78 : vector<16x16x16xf32>
    %80 = vector.shape_cast %79 : vector<16x16x16xf32> to vector<256x16xf32>
    %81 = arith.truncf %80 : vector<256x16xf32> to vector<256x16xbf16>
    %c0_35 = arith.constant 0 : index
    %c0_36 = arith.constant 0 : index
    %c0_37 = arith.constant 0 : index
    %82 = vector.load %arg5[%c0_35, %c0_36, %c0_37] : memref<1x256x16xbf16, #tpu.memory_space<vmem>>, vector<1x256x16xbf16>
    %83 = vector.shape_cast %82 : vector<1x256x16xbf16> to vector<256x16xbf16>
    %84 = vector.shape_cast %81 : vector<256x16xbf16> to vector<1x256x16xbf16>
    tpu.vector_store %arg5[%c0_35, %c0_36, %c0_37], %84 {strides = array<i32>} : memref<1x256x16xbf16, #tpu.memory_space<vmem>>, vector<1x256x16xbf16>,
    return
  }
  func.func @transform_0(%arg0: i32) -> (i32, i32, i32) {
    %c0_i32 = arith.constant 0 : i32
    %c0_i32_0 = arith.constant 0 : i32
    %c0_i32_1 = arith.constant 0 : i32
    return %arg0, %c0_i32, %c0_i32_0 : i32, i32, i32
  }
  func.func @transform_1(%arg0: i32) -> (i32, i32) {
    %c0_i32 = arith.constant 0 : i32
    %c0_i32_0 = arith.constant 0 : i32
    %c0_i32_1 = arith.constant 0 : i32
    return %c0_i32, %c0_i32_0 : i32, i32
  }
  func.func @transform_2(%arg0: i32) -> (i32, i32) {
    %c0_i32 = arith.constant 0 : i32
    %c0_i32_0 = arith.constant 0 : i32
    %c0_i32_1 = arith.constant 0 : i32
    return %c0_i32, %c0_i32_0 : i32, i32
  }
  func.func @transform_3(%arg0: i32) -> (i32, i32) {
    %c0_i32 = arith.constant 0 : i32
    %c0_i32_0 = arith.constant 0 : i32
    %c0_i32_1 = arith.constant 0 : i32
    return %c0_i32, %c0_i32_0 : i32, i32
  }
  func.func @transform_4(%arg0: i32) -> (i32, i32, i32) {
    %c0_i32 = arith.constant 0 : i32
    %c0_i32_0 = arith.constant 0 : i32
    %c0_i32_1 = arith.constant 0 : i32
    return %arg0, %c0_i32, %c0_i32_0 : i32, i32, i32
  }
}

</mosaic_0001>

<bundles_post_ra>
// kernel: tpu_custom_call.1
= control target key start
LH: loop header
LB: loop body
LE: loop exit
PB: predicated region body
PF: predicated region fallthrough
CT: control target
= control target key end

     0   :  { %s2937_s15 = smov 0   ;;  %s4896_s0 = inlined_call_operand.vmem [shape: bf16[2,256,16], index: 0, kind: input, shape index: {}]   ;;  %s4897_s1 = inlined_call_operand.vmem [shape: bf16[16,16], index: 1, kind: input, shape index: {}]   ;;  %s4898_s2 = inlined_call_operand.vmem [shape: f32[9,16], index: 2, kind: input, shape index: {}]   ;;  %s4899_s3 = inlined_call_operand.vmem [shape: f32[1,16], index: 3, kind: input, shape index: {}]   ;;  %s4900_s4 = inlined_call_operand.vmem [shape: bf16[2,256,16], index: 4, kind: output, shape index: {}]  }
   0x1 LB: > { %s2708_s16 = sadd.s32 4294967295, %s2909_s15   ;;  %p2712_p0 = scmp.ge.s32.totalorder %s2909_s15, 1  ;;  %s2909_s15 = sphi %s2937_s15, %s14_s15  }
   0x2   : > { %p162_p1 = scmp.lt.s32.totalorder %s2909_s15, 3 }
   0x4   : > { %p163_p2 = pnand %p2712_p0, %p162_p1 }
   0x6   : > { %166 = sbr.rel (%p163_p2) target bundleno = 556 (0x22c), region = 36 }
   0xd   : > { %v2882_v0 = vld [vmem:[%s4897_s1] sm:$0xff]   ;;  %p188_p3 = scmp.lt.s32.totalorder %s2708_s16, 1  ;;  %vm319_vm0 = vcmask 130048   ;;  %v2911_v17 = vmov 0.0   ;;  %vm538_vm1 = vcmask 122880   ;;  %vm531_vm2 = vcmask 123904  }
   0xe   : > { %2837 = vmatprep.subr.bf16.mxu0 %v2882_v0  ;;  %2871 = vmatprep.subr.bf16.mxu1 %v2882_v0  ;;  %529 = vst.msk [vmem:[#allocation2] sm:$0xff] %vm319_vm0, %v2911_v17  ;;  %530 = vst.msk [vmem:[#allocation2 + $0x8] sm:$0xff] %vm319_vm0, %v2911_v17  ;;  %v661_v18 = vlaneseq  ;;  %v603_v21 = vld [vmem:[%s4898_s2] sm:$0xff]  ;;  %vm829_vm3 = vcmask 1046528   ;;  %vm1074_vm4 = vcmask 1045504   ;;  %vm2620_vm5 = vcmask 125952  }
   0xf   : > { %s5237_s16 = smov (!%p188_p3, %s2708_s16), 1  ;;  %2838 = vmatpush3.bf16.msra.mxu0 %v2882_v0  ;;  %2872 = vmatpush3.bf16.msra.mxu1 %v2882_v0  ;;  %534 = vst.msk [vmem:[#allocation2 + $0x198] sm:$0xff] %vm319_vm0, %v2911_v17  ;;  %535 = vst.msk [vmem:[#allocation2 + $0x1a0] sm:$0xff] %vm319_vm0, %v2911_v17  ;;  %v3044_v38 = vld [vmem:[%s4899_s3] ss:$0 sm:$0xff] }
  0x10   : > { %s2786_s19 = sshll.u32 %s5237_s16, 7  ;;  %540 = vst.msk [vmem:[#allocation2 + $0x30] sm:$0x1] %vm538_vm1, %v2911_v17  ;;  %539 = vst.msk [vmem:[#allocation2 + $0x18] sm:$0x1] %vm538_vm1, %v2911_v17  ;;  %v662_v19 = vshrl.u32 %v661_v18, 7 }
  0x11   : > { %s2956_s22 = scalar_lea.vmem %s4896_s0, %s2786_s19  ;;  %541 = vst.msk [vmem:[#allocation2 + $0x48] sm:$0x1] %vm538_vm1, %v2911_v17  ;;  %542 = vst.msk [vmem:[#allocation2 + $0x60] sm:$0x1] %vm538_vm1, %v2911_v17  ;;  %s3466_s5 = scalar_lea.vmem %s4900_s4, %s2786_s19 }
  0x12   : > { %v2883_v1 = vld [vmem:[%s2956_s22] sm:$0xff]   ;;  %v2885_v3 = vld [vmem:[%s2956_s22 + $0x8] sm:$0xff]   ;;  %v2887_v5 = vld [vmem:[%s2956_s22 + $0x10] sm:$0xff]   ;;  %543 = vst.msk [vmem:[#allocation2 + $0x78] sm:$0x1] %vm538_vm1, %v2911_v17  ;;  %v731_v20 = vsub.s32 1, %v662_v19 }
  0x13   : > { %v2884_v2 = vld [vmem:[%s2956_s22 + $0x40] sm:$0xff]   ;;  %2839 = vmatprep.mubr.msk.bf16.mxu0 %vm319_vm0, %v2883_v1  ;;  %v2886_v4 = vld [vmem:[%s2956_s22 + $0x48] sm:$0xff]   ;;  %v2888_v6 = vld [vmem:[%s2956_s22 + $0x50] sm:$0xff]   ;;  %544 = vst.msk [vmem:[#allocation2 + $0x90] sm:$0x1] %vm538_vm1, %v2911_v17  ;;  %v663_v22 = vsub.s32 0, %v662_v19 }
  0x14   : > { %2855 = vmatprep.mubr.msk.bf16.mxu1 %vm319_vm0, %v2884_v2  ;;  %2840 = vmatmul.mubr.msk.bf16.vlgmr.msra.gmra.mrb[0].mxu0 %vm319_vm0, %v2885_v3  ;;  %v2889_v7 = vld [vmem:[%s2956_s22 + $0x18] sm:$0xff]   ;;  %v2891_v9 = vld [vmem:[%s2956_s22 + $0x20] sm:$0xff]   ;;  %v2893_v11 = vld [vmem:[%s2956_s22 + $0x28] sm:$0xff]   ;;  %545 = vst.msk [vmem:[#allocation2 + $0xa8] sm:$0x1] %vm538_vm1, %v2911_v17  ;;  %v3029_v23 = vrot.slane %v603_v21, %v731_v20  ;;  %v976_v24 = vsub.s32 2, %v662_v19 }
  0x15   : > { %2856 = vmatmul.mubr.msk.bf16.vlgmr.msra.gmra.mrb[0].mxu1 %vm319_vm0, %v2886_v4  ;;  %2843 = vmatprep.mubr.msk.bf16.mxu0 %vm319_vm0, %v2887_v5  ;;  %v2890_v8 = vld [vmem:[%s2956_s22 + $0x58] sm:$0xff]   ;;  %v2892_v10 = vld [vmem:[%s2956_s22 + $0x60] sm:$0xff]   ;;  %v2894_v12 = vld [vmem:[%s2956_s22 + $0x68] sm:$0xff]   ;;  %546 = vst.msk [vmem:[#allocation2 + $0xc0] sm:$0x1] %vm538_vm1, %v2911_v17  ;;  %v3031_v28 = vrot.slane %v603_v21, %v663_v22  ;;  %v1269_v42 = vsub.s32 3, %v662_v19 }
  0x16   : > { %2859 = vmatprep.mubr.msk.bf16.mxu1 %vm319_vm0, %v2888_v6  ;;  %v2895_v13 = vld [vmem:[%s2956_s22 + $0x30] sm:$0xff]   ;;  %v2897_v15 = vld [vmem:[%s2956_s22 + $0x38] sm:$0xff]   ;;  %547 = vst.msk [vmem:[#allocation2 + $0xd8] sm:$0x1] %vm538_vm1, %v2911_v17  ;;  %548 = vst.msk [vmem:[#allocation2 + $0xf0] sm:$0x1] %vm538_vm1, %v2911_v17  ;;  %v3033_v29 = vrot.slane %v603_v21, %v976_v24 }
  0x17   : > { %v2896_v14 = vld [vmem:[%s2956_s22 + $0x70] sm:$0xff]   ;;  %v2898_v16 = vld [vmem:[%s2956_s22 + $0x78] sm:$0xff]   ;;  %549 = vst.msk [vmem:[#allocation2 + $0x108] sm:$0x1] %vm538_vm1, %v2911_v17  ;;  %550 = vst.msk [vmem:[#allocation2 + $0x120] sm:$0x1] %vm538_vm1, %v2911_v17  ;;  %v3059_v0 = vrot.slane %v603_v21, %v1269_v42 }
  0x18   : > { %551 = vst.msk [vmem:[#allocation2 + $0x138] sm:$0x1] %vm538_vm1, %v2911_v17  ;;  %552 = vst.msk [vmem:[#allocation2 + $0x150] sm:$0x1] %vm538_vm1, %v2911_v17  ;;  %v613_v25 = vld [vmem:[#allocation2] sm:$0xff]  ;;  %v614_v26 = vld [vmem:[#allocation2 + $0x8] sm:$0xff] }
  0x19   : > { %553 = vst.msk [vmem:[#allocation2 + $0x168] sm:$0x1] %vm538_vm1, %v2911_v17  ;;  %554 = vst.msk [vmem:[#allocation2 + $0x180] sm:$0x1] %vm538_vm1, %v2911_v17  ;;  %v733_v30 = vmul.f32 %v3029_v23, %v613_v25  ;;  %v734_v31 = vmul.f32 %v3029_v23, %v614_v26  ;;  %v665_v33 = vmul.f32 %v3031_v28, %v613_v25  ;;  %v1337_v44 = vsub.s32 4, %v662_v19 }
  0x1a   : > { %555 = vst.msk [vmem:[#allocation2 + $0x29] sm:$0x1] %vm538_vm1, %v2911_v17  ;;  %556 = vst.msk [vmem:[#allocation2 + $0x41] sm:$0x1] %vm538_vm1, %v2911_v17  ;;  %v978_v36 = vmul.f32 %v3033_v29, %v613_v25  ;;  %v666_v37 = vmul.f32 %v3031_v28, %v614_v26  ;;  %v979_v39 = vmul.f32 %v3033_v29, %v614_v26  ;;  %v1581_v54 = vsub.s32 5, %v662_v19 }
  0x1b   : > { %557 = vst.msk [vmem:[#allocation2 + $0x59] sm:$0x1] %vm538_vm1, %v2911_v17  ;;  %558 = vst.msk [vmem:[#allocation2 + $0x71] sm:$0x1] %vm538_vm1, %v2911_v17  ;;  %v830_v34 = vrot.slane %v733_v30, 1  ;;  %v831_v35 = vrot.slane %v734_v31, 1  ;;  %v697_v45 = vadd.f32 %v3044_v38, %v665_v33  ;;  %v3064_v3 = vrot.slane %v603_v21, %v1337_v44 }
  0x1c   : > { %2844 = vmatmul.mubr.msk.bf16.gmra.mrb[4].mxu0 %vm319_vm0, %v2889_v7  ;;  %559 = vst.msk [vmem:[#allocation2 + $0x89] sm:$0x1] %vm538_vm1, %v2911_v17  ;;  %560 = vst.msk [vmem:[#allocation2 + $0xa1] sm:$0x1] %vm538_vm1, %v2911_v17  ;;  %v698_v47 = vadd.f32 %v3044_v38, %v666_v37  ;;  %v1075_v50 = vrot.slane %v978_v36, 2  ;;  %v1076_v51 = vrot.slane %v979_v39, 2  ;;  %v3066_v4 = vrot.slane %v603_v21, %v1581_v54 }
  0x1d   : > { %2860 = vmatmul.mubr.msk.bf16.gmra.mrb[4].mxu1 %vm319_vm0, %v2890_v8  ;;  %2847 = vmatprep.mubr.msk.bf16.mxu0 %vm319_vm0, %v2891_v9  ;;  %561 = vst.msk [vmem:[#allocation2 + $0xb9] sm:$0x1] %vm538_vm1, %v2911_v17  ;;  %562 = vst.msk [vmem:[#allocation2 + $0xd1] sm:$0x1] %vm538_vm1, %v2911_v17  ;;  %v832_v46 = vsel %vm829_vm3, %v830_v34, %v831_v35  ;;  %v1874_v55 = vsub.s32 6, %v662_v19  ;;  %v1942_v56 = vsub.s32 7, %v662_v19 }
  0x1e   : > { %2863 = vmatprep.mubr.msk.bf16.mxu1 %vm319_vm0, %v2892_v10  ;;  %563 = vst.msk [vmem:[#allocation2 + $0xe9] sm:$0x1] %vm538_vm1, %v2911_v17  ;;  %564 = vst.msk [vmem:[#allocation2 + $0x101] sm:$0x1] %vm538_vm1, %v2911_v17  ;;  %v942_v61 = vadd.f32 %v832_v46, %v697_v45  ;;  %v1077_v1 = vsel %vm1074_vm4, %v1075_v50, %v1076_v51  ;;  %v3075_v7 = vld [vmem:[%s4898_s2 + $0x8] ss:$0 sm:$0xff] }
  0x1f   : > { %565 = vst.msk [vmem:[#allocation2 + $0x119] sm:$0x1] %vm538_vm1, %v2911_v17  ;;  %566 = vst.msk [vmem:[#allocation2 + $0x131] sm:$0x1] %vm538_vm1, %v2911_v17  ;;  %v3068_v5 = vrot.slane %v603_v21, %v1874_v55  ;;  %v3070_v6 = vrot.slane %v603_v21, %v1942_v56 }
  0x20   : > { %567 = vst.msk [vmem:[#allocation2 + $0x149] sm:$0x1] %vm538_vm1, %v2911_v17  ;;  %568 = vst.msk [vmem:[#allocation2 + $0x161] sm:$0x1] %vm538_vm1, %v2911_v17  ;;  %v3077_v9 = vadd.f32 %v1077_v1, %v942_v61 }
  0x21   : > { %569 = vst.msk [vmem:[#allocation2 + $0x179] sm:$0x1] %vm538_vm1, %v2911_v17  ;;  %570 = vst.msk [vmem:[#allocation2 + $0x191] sm:$0x1] %vm538_vm1, %v2911_v17 }
  0x22   : > { %532 = vst.msk [vmem:[#allocation2 + $0x10] sm:$0x3] %vm531_vm2, %v2911_v17  ;;  %536 = vst.msk [vmem:[#allocation2 + $0x1a8] sm:$0x3] %vm531_vm2, %v2911_v17 }
  0x24   : > { %2848 = vmatmul.mubr.msk.bf16.gmra.mrb[8].mxu0 %vm319_vm0, %v2893_v11 }
  0x25   : > { %2864 = vmatmul.mubr.msk.bf16.gmra.mrb[8].mxu1 %vm319_vm0, %v2894_v12  ;;  %2851 = vmatprep.mubr.msk.bf16.mxu0 %vm319_vm0, %v2895_v13 }
  0x26   : > { %2867 = vmatprep.mubr.msk.bf16.mxu1 %vm319_vm0, %v2896_v14 }
  0x29   : > { %v615_v27 = vld [vmem:[#allocation2 + $0x10] sm:$0x3] }
  0x2a   : > { %v735_v32 = vmul.f32 %v3029_v23, %v615_v27  ;;  %v980_v41 = vmul.f32 %v3033_v29, %v615_v27 }
  0x2c   : > { %2852 = vmatmul.mubr.msk.bf16.gmra.mrb[12].mxu0 %vm319_vm0, %v2897_v15  ;;  %v833_v40 = vrot.slane %v735_v32, 1  ;;  %v1078_v53 = vrot.slane %v980_v41, 2 }
  0x2d   : > { %2868 = vmatmul.mubr.msk.bf16.gmra.mrb[12].mxu1 %vm319_vm0, %v2898_v16 }
  0x2e   : > { %v834_v52 = vsel %vm829_vm3, %v831_v35, %v833_v40  ;;  %v1079_v2 = vsel %vm1074_vm4, %v1076_v51, %v1078_v53 }
  0x2f   : > { %v943_v62 = vadd.f32 %v834_v52, %v698_v47 }
  0x31   : > { %v3079_v10 = vadd.f32 %v1079_v2, %v943_v62 }
  0xe7   : > { %v2841_v43 = vpop.f32.mrb[0].mxu0 }
  0xe8   : > { %573 = vst.msk [vmem:[#allocation2 + $0x31] sm:$0xff] %vm319_vm0, %v2841_v43  ;;  %v2857_v48 = vpop.f32.mrb[0].mxu1  ;;  %v402_v49 = vpop.f32.mrb[1].mxu0 }
  0xe9   : > { %589 = vst.msk [vmem:[#allocation2 + $0xf1] sm:$0xff] %vm319_vm0, %v2857_v48  ;;  %571 = vst.msk [vmem:[#allocation2 + $0x19] sm:$0xff] %vm319_vm0, %v402_v49  ;;  %v466_v57 = vpop.f32.mrb[1].mxu1  ;;  %v2842_v58 = vpop.f32.mrb[2].mxu0 }
  0xea   : > { %587 = vst.msk [vmem:[#allocation2 + $0xd9] sm:$0xff] %vm319_vm0, %v466_v57  ;;  %574 = vst.msk [vmem:[#allocation2 + $0x39] sm:$0xff] %vm319_vm0, %v2842_v58  ;;  %v2858_v59 = vpop.f32.mrb[2].mxu1  ;;  %v405_v60 = vpop.f32.mrb[3].mxu0 }
  0xeb   : > { %590 = vst.msk [vmem:[#allocation2 + $0xf9] sm:$0xff] %vm319_vm0, %v2858_v59  ;;  %572 = vst.msk [vmem:[#allocation2 + $0x21] sm:$0xff] %vm319_vm0, %v405_v60  ;;  %v469_v63 = vpop.f32.mrb[3].mxu1 }
  0xec   : > { %588 = vst.msk [vmem:[#allocation2 + $0xe1] sm:$0xff] %vm319_vm0, %v469_v63 }
  0xef   : > { %v619_v8 = vld [vmem:[#allocation2 + $0x30] sm:$0xff]  ;;  %v2845_v11 = vpop.f32.mrb[4].mxu0 }
  0xf0   : > { %v669_v12 = vmul.f32 %v3031_v28, %v619_v8  ;;  %v3083_v13 = vmul.f32 %v3029_v23, %v619_v8  ;;  %v3086_v14 = vmul.f32 %v3033_v29, %v619_v8  ;;  %v3089_v15 = vmul.f32 %v3059_v0, %v619_v8  ;;  %v643_v16 = vld [vmem:[#allocation2 + $0xf0] sm:$0xff]  ;;  %577 = vst.msk [vmem:[#allocation2 + $0x61] sm:$0xff] %vm319_vm0, %v2845_v11  ;;  %v2861_v17 = vpop.f32.mrb[4].mxu1  ;;  %v418_v18 = vpop.f32.mrb[5].mxu0  ;;  %v616_v41 = vld [vmem:[#allocation2 + $0x18] sm:$0xff] }
  0xf1   : > { %v3093_v19 = vmul.f32 %v3064_v3, %v619_v8  ;;  %v3096_v20 = vmul.f32 %v3066_v4, %v619_v8  ;;  %v3099_v21 = vmul.f32 %v3068_v5, %v619_v8  ;;  %v3102_v22 = vmul.f32 %v3070_v6, %v619_v8  ;;  %593 = vst.msk [vmem:[#allocation2 + $0x121] sm:$0xff] %vm319_vm0, %v2861_v17  ;;  %v482_v24 = vpop.f32.mrb[5].mxu1  ;;  %v2846_v25 = vpop.f32.mrb[6].mxu0  ;;  %v640_v55 = vld [vmem:[#allocation2 + $0xd8] sm:$0xff] }
  0xf2   : > { %575 = vst.msk [vmem:[#allocation2 + $0x49] sm:$0xff] %vm319_vm0, %v418_v18  ;;  %v3107_v26 = vadd.f32 %v3044_v38, %v669_v12  ;;  %v840_v27 = vrot.slane %v3083_v13, 1  ;;  %v3112_v31 = vmul.f32 %v3075_v7, %v619_v8  ;;  %591 = vst.msk [vmem:[#allocation2 + $0x109] sm:$0xff] %vm319_vm0, %v482_v24  ;;  %v685_v35 = vmul.f32 %v3031_v28, %v643_v16  ;;  %v2862_v46 = vpop.f32.mrb[6].mxu1  ;;  %v421_v56 = vpop.f32.mrb[7].mxu0 }
  0xf3   : > { %578 = vst.msk [vmem:[#allocation2 + $0x69] sm:$0xff] %vm319_vm0, %v2846_v25  ;;  %v3122_v37 = vmul.f32 %v3029_v23, %v643_v16  ;;  %v3125_v39 = vmul.f32 %v3033_v29, %v643_v16  ;;  %v3128_v40 = vmul.f32 %v3059_v0, %v643_v16  ;;  %v3134_v43 = vmul.f32 %v3064_v3, %v643_v16  ;;  %v485_v61 = vpop.f32.mrb[7].mxu1 }
  0xf4   : > { %v3131_v42 = vadd.f32 %v3044_v38, %v685_v35  ;;  %v3137_v44 = vmul.f32 %v3066_v4, %v643_v16  ;;  %v3140_v45 = vmul.f32 %v3068_v5, %v643_v16  ;;  %v3145_v49 = vmul.f32 %v3070_v6, %v643_v16  ;;  %594 = vst.msk [vmem:[#allocation2 + $0x129] sm:$0xff] %vm319_vm0, %v2862_v46  ;;  %v1224_v35 = vld [vmem:[#allocation2 + $0x40] sm:$0x3] }
  0xf5   : > { %4930 = vst [vmem:[#allocation3_spill] sm:$0xff] %v3125_v39  ;;  %4931 = vst [vmem:[#allocation4_spill] sm:$0xff] %v3128_v40  ;;  %v3148_v50 = vmul.f32 %v3075_v7, %v643_v16  ;;  %v667_v53 = vmul.f32 %v3031_v28, %v616_v41  ;;  %v3155_v54 = vmul.f32 %v3029_v23, %v616_v41  ;;  %v4946_v40 = vrot.slane %v3122_v37, 1 }
  0xf6   : > { %4932 = vst [vmem:[#allocation5_spill] sm:$0xff] %v3131_v42  ;;  %4933 = vst [vmem:[#allocation6_spill] sm:$0xff] %v3137_v44  ;;  %v3160_v59 = vmul.f32 %v3033_v29, %v616_v41  ;;  %v1271_v60 = vmul.f32 %v3059_v0, %v616_v41  ;;  %v3169_v2 = vmul.f32 %v3064_v3, %v616_v41  ;;  %v618_v42 = vld [vmem:[#allocation2 + $0x28] sm:$0x3] }
  0xf7   : > { %4934 = vst [vmem:[#allocation7_spill] sm:$0xff] %v3140_v45  ;;  %576 = vst.msk [vmem:[#allocation2 + $0x51] sm:$0xff] %vm319_vm0, %v421_v56  ;;  %v2849_v62 = vpop.f32.mrb[8].mxu0  ;;  %v3165_v63 = vadd.f32 %v3044_v38, %v667_v53  ;;  %v3172_v8 = vmul.f32 %v3066_v4, %v616_v41  ;;  %v683_v17 = vmul.f32 %v3031_v28, %v640_v55 }
  0xf8   : > { %592 = vst.msk [vmem:[#allocation2 + $0x111] sm:$0xff] %vm319_vm0, %v485_v61  ;;  %581 = vst.msk [vmem:[#allocation2 + $0x91] sm:$0xff] %vm319_vm0, %v2849_v62  ;;  %v2865_v11 = vpop.f32.mrb[8].mxu1  ;;  %v3178_v16 = vadd.f32 %v1271_v60, %v3077_v9  ;;  %v3182_v18 = vmul.f32 %v3029_v23, %v640_v55  ;;  %v434_v24 = vpop.f32.mrb[9].mxu0  ;;  %v3188_v41 = vmul.f32 %v3033_v29, %v640_v55  ;;  %v620_v9 = vld [vmem:[#allocation2 + $0x38] sm:$0xff] }
  0xf9   : > { %597 = vst.msk [vmem:[#allocation2 + $0x151] sm:$0xff] %vm319_vm0, %v2865_v11  ;;  %v3191_v46 = vmul.f32 %v3059_v0, %v640_v55  ;;  %579 = vst.msk [vmem:[#allocation2 + $0x79] sm:$0xff] %vm319_vm0, %v434_v24  ;;  %v3195_v53 = vadd.f32 %v3044_v38, %v683_v17  ;;  %v3199_v60 = vmul.f32 %v3064_v3, %v640_v55  ;;  %v621_v62 = vld [vmem:[#allocation2 + $0x40] sm:$0x3]  ;;  %v498_v25 = vpop.f32.mrb[9].mxu1  ;;  %v2850_v44 = vpop.f32.mrb[10].mxu0 }
  0xfa   : > { %v3202_v61 = vmul.f32 %v3066_v4, %v640_v55  ;;  %v3206_v52 = vmul.f32 %v3068_v5, %v640_v55  ;;  %v3209_v48 = vmul.f32 %v3070_v6, %v640_v55  ;;  %v3212_v17 = vmul.f32 %v3075_v7, %v640_v55  ;;  %595 = vst.msk [vmem:[#allocation2 + $0x139] sm:$0xff] %vm319_vm0, %v498_v25 }
  0xfb   : > { %4935 = vst [vmem:[#allocation8_spill] sm:$0xff] %v3191_v46  ;;  %v670_v30 = vmul.f32 %v3031_v28, %v620_v9  ;;  %v740_v56 = vmul.f32 %v3029_v23, %v620_v9  ;;  %v741_v1 = vmul.f32 %v3029_v23, %v621_v62  ;;  %v3222_v58 = vmul.f32 %v3033_v29, %v620_v9 }
  0xfc   : > { %4936 = vst [vmem:[#allocation9_spill] sm:$0xff] %v3206_v52  ;;  %v986_v24 = vmul.f32 %v3033_v29, %v621_v62  ;;  %v3228_v57 = vmul.f32 %v3059_v0, %v620_v9  ;;  %v1343_v12 = vmul.f32 %v3064_v3, %v620_v9  ;;  %v1344_v47 = vmul.f32 %v3064_v3, %v1224_v35  ;;  %v1826_v62 = vld [vmem:[#allocation2 + $0x40] sm:$0x3]  ;;  %v644_v52 = vld [vmem:[#allocation2 + $0xf8] sm:$0xff] }
  0xfd   : > { %v702_v55 = vadd.f32 %v3044_v38, %v670_v30  ;;  %v841_v33 = vrot.slane %v740_v56, 1  ;;  %v843_v51 = vrot.slane %v741_v1, 1  ;;  %v3239_v30 = vmul.f32 %v3066_v4, %v620_v9  ;;  %582 = vst.msk [vmem:[#allocation2 + $0x99] sm:$0xff] %vm319_vm0, %v2850_v44 }
  0xfe   : > { %v1088_v25 = vrot.slane %v986_v24, 2  ;;  %v1588_v56 = vmul.f32 %v3066_v4, %v1224_v35  ;;  %v1441_v34 = vrot.slane %v1343_v12, 1  ;;  %v1443_v32 = vrot.slane %v1344_v47, 1  ;;  %v645_v35 = vld [vmem:[#allocation2 + $0x100] sm:$0x3] }
  0xff   : > { %v3236_v36 = vsel %vm829_vm3, %v840_v27, %v841_v33  ;;  %v844_v1 = vsel %vm829_vm3, %v841_v33, %v843_v51  ;;  %v3244_v11 = vmul.f32 %v3068_v5, %v620_v9  ;;  %v4938_v13 = vrot.slane %v3222_v58, 2 }
 0x100   : > { %v3246_v45 = vadd.f32 %v844_v1, %v702_v55  ;;  %v4902_v24 = vrot.slane %v3239_v30, 2  ;;  %v1687_v46 = vrot.slane %v1588_v56, 2  ;;  %v4940_v33 = vrot.slane %v3093_v19, 1 }
 0x101   : > { %v3251_v27 = vsel %vm1074_vm4, %v4938_v13, %v1088_v25  ;;  %v3260_v51 = vsel %vm829_vm3, %v1441_v34, %v1443_v32  ;;  %v1945_v12 = vmul.f32 %v3070_v6, %v620_v9  ;;  %v1946_v55 = vmul.f32 %v3070_v6, %v1826_v62 }
 0x102   : > { %4937 = vst [vmem:[#allocation10_spill] sm:$0xff] %v3246_v45  ;;  %4939 = vst [vmem:[#allocation11_spill] sm:$0xff] %v3251_v27  ;;  %v3257_v47 = vsel %vm829_vm3, %v4940_v33, %v1441_v34  ;;  %v3268_v25 = vsel %vm1074_vm4, %v4902_v24, %v1687_v46  ;;  %v2189_v56 = vmul.f32 %v3075_v7, %v620_v9  ;;  %v4944_v46 = vrot.slane %v3102_v22, 1  ;;  %v1248_v24 = vld [vmem:[#allocation2 + $0x100] sm:$0x3] }
 0x103   : > { %4941 = vst [vmem:[#allocation12_spill] sm:$0xff] %v3260_v51  ;;  %4942 = vst [vmem:[#allocation13_spill] sm:$0xff] %v3268_v25  ;;  %v2190_v19 = vmul.f32 %v3075_v7, %v1826_v62  ;;  %v686_v1 = vmul.f32 %v3031_v28, %v644_v52  ;;  %v2041_v13 = vrot.slane %v1945_v12, 1  ;;  %v2043_v32 = vrot.slane %v1946_v55, 1  ;;  %v617_v22 = vld [vmem:[#allocation2 + $0x20] sm:$0xff] }
 0x104   : > { %v764_v34 = vmul.f32 %v3029_v23, %v644_v52  ;;  %v765_v33 = vmul.f32 %v3029_v23, %v645_v35  ;;  %v2285_v51 = vrot.slane %v2189_v56, 2  ;;  %v3277_v45 = vmul.f32 %v3033_v29, %v644_v52 }
 0x105   : > { %v2287_v27 = vrot.slane %v2190_v19, 2  ;;  %v718_v44 = vadd.f32 %v3044_v38, %v686_v1  ;;  %v3282_v9 = vsel %vm829_vm3, %v4944_v46, %v2041_v13  ;;  %v3285_v62 = vsel %vm829_vm3, %v2041_v13, %v2043_v32  ;;  %v2866_v46 = vpop.f32.mrb[10].mxu1 }
 0x106   : > { %4943 = vst [vmem:[#allocation14_spill] sm:$0xff] %v3277_v45  ;;  %v881_v12 = vrot.slane %v764_v34, 1  ;;  %v883_v55 = vrot.slane %v765_v33, 1  ;;  %v4945_v25 = vrot.slane %v3112_v31, 2  ;;  %v1010_v1 = vmul.f32 %v3033_v29, %v645_v35  ;;  %v1850_v34 = vld [vmem:[#allocation2 + $0x100] sm:$0x3] }
 0x107   : > { %v3293_v19 = vsel %vm1074_vm4, %v2285_v51, %v2287_v27  ;;  %v3304_v31 = vmul.f32 %v3059_v0, %v644_v52  ;;  %598 = vst.msk [vmem:[#allocation2 + $0x159] sm:$0xff] %vm319_vm0, %v2866_v46  ;;  %v3312_v37 = vmul.f32 %v3066_v4, %v644_v52  ;;  %v1612_v33 = vmul.f32 %v3066_v4, %v1248_v24 }
 0x108   : > { %v3290_v56 = vsel %vm1074_vm4, %v4945_v25, %v2285_v51  ;;  %v3300_v13 = vsel %vm829_vm3, %v4946_v40, %v881_v12  ;;  %v884_v32 = vsel %vm829_vm3, %v881_v12, %v883_v55  ;;  %v1367_v25 = vmul.f32 %v3064_v3, %v644_v52 }
 0x109   : > { %4947 = vst [vmem:[#allocation15_spill] sm:$0xff] %v3300_v13  ;;  %v3308_v27 = vadd.f32 %v884_v32, %v718_v44  ;;  %v1128_v35 = vrot.slane %v1010_v1, 2  ;;  %v1368_v51 = vmul.f32 %v3064_v3, %v1248_v24  ;;  %v3316_v12 = vmul.f32 %v3068_v5, %v644_v52 }
 0x10a   : > { %v1481_v40 = vrot.slane %v1367_v25, 1  ;;  %v1969_v55 = vmul.f32 %v3070_v6, %v644_v52  ;;  %v4950_v39 = vrot.slane %v3277_v45, 2  ;;  %v4905_v46 = vrot.slane %v3312_v37, 2 }
 0x10b   : > { %4948 = vst [vmem:[#allocation16_spill] sm:$0xff] %v3308_v27  ;;  %4949 = vst [vmem:[#allocation17_spill] sm:$0xff] %v3316_v12  ;;  %v1483_v1 = vrot.slane %v1368_v51, 1  ;;  %v1970_v32 = vmul.f32 %v3070_v6, %v1850_v34  ;;  %v4952_v25 = vrot.slane %v3134_v43, 1  ;;  %v1727_v27 = vrot.slane %v1612_v33, 2 }
 0x10c   : > { %v3322_v44 = vsel %vm1074_vm4, %v4950_v39, %v1128_v35  ;;  %v2081_v12 = vrot.slane %v1969_v55, 1  ;;  %v2213_v13 = vmul.f32 %v3075_v7, %v644_v52  ;;  %v2214_v35 = vmul.f32 %v3075_v7, %v1850_v34 }
 0x10d   : > { %4951 = vst [vmem:[#allocation18_spill] sm:$0xff] %v3322_v44  ;;  %v3329_v24 = vsel %vm829_vm3, %v4952_v25, %v1481_v40  ;;  %v3333_v45 = vsel %vm829_vm3, %v1481_v40, %v1483_v1  ;;  %v2083_v39 = vrot.slane %v1970_v32, 1  ;;  %v668_v51 = vmul.f32 %v3031_v28, %v617_v22 }
 0x10e   : > { %4953 = vst [vmem:[#allocation19_spill] sm:$0xff] %v3333_v45  ;;  %v3340_v43 = vsel %vm1074_vm4, %v4905_v46, %v1727_v27  ;;  %v4955_v25 = vrot.slane %v3145_v49, 1  ;;  %v2325_v52 = vrot.slane %v2213_v13, 2  ;;  %v737_v55 = vmul.f32 %v3029_v23, %v617_v22  ;;  %v1221_v45 = vld [vmem:[#allocation2 + $0x28] sm:$0x3] }
 0x10f   : > { %4954 = vst [vmem:[#allocation20_spill] sm:$0xff] %v3340_v43  ;;  %v3349_v40 = vsel %vm829_vm3, %v2081_v12, %v2083_v39  ;;  %v2327_v1 = vrot.slane %v2214_v35, 2  ;;  %v700_v34 = vadd.f32 %v3044_v38, %v668_v51  ;;  %v738_v32 = vmul.f32 %v3029_v23, %v618_v42 }
 0x110   : > { %v3345_v33 = vsel %vm829_vm3, %v4955_v25, %v2081_v12  ;;  %4957 = vst [vmem:[#allocation22_spill] sm:$0xff] %v3349_v40  ;;  %v4958_v27 = vrot.slane %v3148_v50, 2  ;;  %v836_v49 = vrot.slane %v737_v55, 1  ;;  %v982_v25 = vmul.f32 %v3033_v29, %v617_v22 }
 0x111   : > { %4956 = vst [vmem:[#allocation21_spill] sm:$0xff] %v3345_v33  ;;  %v983_v13 = vmul.f32 %v3033_v29, %v618_v42  ;;  %v3361_v33 = vsel %vm1074_vm4, %v2325_v52, %v2327_v1  ;;  %v838_v12 = vrot.slane %v738_v32, 1  ;;  %v1272_v39 = vmul.f32 %v3059_v0, %v617_v22  ;;  %v3372_v32 = vld [vmem:[#allocation2 + $0xe0] sm:$0xff] }
 0x112   : > { %v3356_v46 = vsel %vm1074_vm4, %v4958_v27, %v2325_v52  ;;  %4960 = vst [vmem:[#allocation24_spill] sm:$0xff] %v3361_v33  ;;  %v1340_v35 = vmul.f32 %v3064_v3, %v617_v22  ;;  %v4961_v51 = vrot.slane %v3155_v54, 1  ;;  %v1081_v40 = vrot.slane %v982_v25, 2 }
 0x113   : > { %4959 = vst [vmem:[#allocation23_spill] sm:$0xff] %v3356_v46  ;;  %v1083_v27 = vrot.slane %v983_v13, 2  ;;  %v1341_v55 = vmul.f32 %v3064_v3, %v1221_v45  ;;  %v437_v46 = vpop.f32.mrb[11].mxu0  ;;  %v839_v43 = vsel %vm829_vm3, %v836_v49, %v838_v12  ;;  %v1304_v52 = vadd.f32 %v1272_v39, %v3079_v10  ;;  %v642_v39 = vld [vmem:[#allocation2 + $0xe8] sm:$0x3] }
 0x114   : > { %v837_v50 = vsel %vm829_vm3, %v4961_v51, %v836_v49  ;;  %v1436_v1 = vrot.slane %v1340_v35, 1  ;;  %580 = vst.msk [vmem:[#allocation2 + $0x81] sm:$0xff] %vm319_vm0, %v437_v46  ;;  %v945_v33 = vadd.f32 %v839_v43, %v700_v34  ;;  %v4962_v54 = vrot.slane %v3160_v59, 2 }
 0x115   : > { %v944_v42 = vadd.f32 %v837_v50, %v3165_v63  ;;  %v1084_v13 = vsel %vm1074_vm4, %v1081_v40, %v1083_v27  ;;  %v1438_v51 = vrot.slane %v1341_v55, 1  ;;  %v4963_v49 = vrot.slane %v3169_v2, 1 }
 0x116   : > { %v1082_v25 = vsel %vm1074_vm4, %v4962_v54, %v1081_v40  ;;  %v1584_v10 = vmul.f32 %v3066_v4, %v617_v22  ;;  %v1585_v12 = vmul.f32 %v3066_v4, %v1221_v45  ;;  %v1190_v46 = vadd.f32 %v1084_v13, %v945_v33 }
 0x117   : > { %v3379_v44 = vadd.f32 %v1082_v25, %v944_v42  ;;  %v1437_v63 = vsel %vm829_vm3, %v4963_v49, %v1436_v1  ;;  %v1439_v43 = vsel %vm829_vm3, %v1436_v1, %v1438_v51  ;;  %v684_v40 = vmul.f32 %v3031_v28, %v3372_v32  ;;  %v1245_v51 = vld [vmem:[#allocation2 + $0xe8] sm:$0x3] }
 0x118   : > { %v1547_v59 = vadd.f32 %v1437_v63, %v3178_v16  ;;  %v1548_v34 = vadd.f32 %v1439_v43, %v1304_v52  ;;  %v1680_v35 = vrot.slane %v1584_v10, 2  ;;  %v1682_v50 = vrot.slane %v1585_v12, 2 }
 0x119   : > { %v761_v2 = vmul.f32 %v3029_v23, %v3372_v32  ;;  %v3393_v27 = vadd.f32 %v3228_v57, %v1190_v46  ;;  %v716_v45 = vadd.f32 %v3044_v38, %v684_v40  ;;  %v762_v22 = vmul.f32 %v3029_v23, %v642_v39 }
 0x11a   : > { %v1006_v33 = vmul.f32 %v3033_v29, %v3372_v32  ;;  %v4964_v16 = vrot.slane %v3172_v8, 2  ;;  %v1683_v42 = vsel %vm1074_vm4, %v1680_v35, %v1682_v50  ;;  %v1007_v1 = vmul.f32 %v3033_v29, %v642_v39 }
 0x11b   : > { %v876_v52 = vrot.slane %v761_v2, 1  ;;  %v1792_v25 = vadd.f32 %v1683_v42, %v1548_v34  ;;  %v878_v57 = vrot.slane %v762_v22, 1  ;;  %v4965_v49 = vrot.slane %v3182_v18, 1 }
 0x11c   : > { %v1681_v55 = vsel %vm1074_vm4, %v4964_v16, %v1680_v35  ;;  %v1121_v13 = vrot.slane %v1006_v33, 2  ;;  %v1123_v10 = vrot.slane %v1007_v1, 2  ;;  %v3409_v8 = vmul.f32 %v3059_v0, %v3372_v32 }
 0x11d   : > { %v1791_v54 = vadd.f32 %v1681_v55, %v1547_v59  ;;  %v877_v63 = vsel %vm829_vm3, %v4965_v49, %v876_v52  ;;  %v1364_v12 = vmul.f32 %v3064_v3, %v3372_v32  ;;  %v1909_v39 = vadd.f32 %v3244_v11, %v1792_v25  ;;  %v501_v55 = vpop.f32.mrb[11].mxu1  ;;  %v625_v49 = vld [vmem:[#allocation2 + $0x60] sm:$0xff] }
 0x11e   : > { %4966 = vst [vmem:[#allocation25_spill] sm:$0xff] %v3409_v8  ;;  %v879_v43 = vsel %vm829_vm3, %v876_v52, %v878_v57  ;;  %v960_v59 = vadd.f32 %v877_v63, %v3195_v53  ;;  %v4967_v40 = vrot.slane %v3188_v41, 2  ;;  %v1124_v35 = vsel %vm1074_vm4, %v1121_v13, %v1123_v10  ;;  %596 = vst.msk [vmem:[#allocation2 + $0x141] sm:$0xff] %vm319_vm0, %v501_v55 }
 0x11f   : > { %v1908_v46 = vadd.f32 %v3099_v21, %v1791_v54  ;;  %v961_v18 = vadd.f32 %v879_v43, %v716_v45  ;;  %v1365_v50 = vmul.f32 %v3064_v3, %v1245_v51  ;;  %v2153_v21 = vadd.f32 %v3285_v62, %v1909_v39  ;;  %v1847_v45 = vld [vmem:[#allocation2 + $0xe8] sm:$0x3] }
 0x120   : > { %v1122_v34 = vsel %vm1074_vm4, %v4967_v40, %v1121_v13  ;;  %v1476_v11 = vrot.slane %v1364_v12, 1  ;;  %v1608_v53 = vmul.f32 %v3066_v4, %v3372_v32  ;;  %v1609_v41 = vmul.f32 %v3066_v4, %v1245_v51 }
 0x121   : > { %v2152_v2 = vadd.f32 %v3282_v9, %v1908_v46  ;;  %v3424_v22 = vadd.f32 %v1122_v34, %v960_v59  ;;  %v1206_v33 = vadd.f32 %v1124_v35, %v961_v18  ;;  %v1478_v16 = vrot.slane %v1365_v50, 1 }
 0x122   : > { %v2397_v52 = vadd.f32 %v3293_v19, %v2153_v21  ;;  %v4968_v9 = vrot.slane %v3199_v60, 1  ;;  %v3438_v1 = vmul.f32 %v3068_v5, %v3372_v32  ;;  %v1722_v19 = vrot.slane %v1609_v41, 2 }
 0x123   : > { %v2396_v42 = vadd.f32 %v3290_v56, %v2152_v2  ;;  %v3442_v54 = vadd.f32 %v3304_v31, %v1206_v33  ;;  %v3445_v25 = vsel %vm829_vm3, %v1476_v11, %v1478_v16  ;;  %v1720_v56 = vrot.slane %v1608_v53, 2  ;;  %v649_v33 = vld [vmem:[#allocation2 + $0x120] sm:$0xff] }
 0x124   : > { %v3434_v62 = vsel %vm829_vm3, %v4968_v9, %v1476_v11  ;;  %4970 = vst [vmem:[#allocation27_spill] sm:$0xff] %v3438_v1  ;;  %4971 = vst [vmem:[#allocation28_spill] sm:$0xff] %v3445_v25  ;;  %v2429_v60 = vmul.f32 0.2, %v2397_v52  ;;  %v1966_v13 = vmul.f32 %v3070_v6, %v3372_v32  ;;  %v1967_v51 = vmul.f32 %v3070_v6, %v1847_v45 }
 0x125   : > { %4969 = vst [vmem:[#allocation26_spill] sm:$0xff] %v3434_v62  ;;  %v2428_v57 = vmul.f32 0.2, %v2396_v42  ;;  %v4972_v63 = vrot.slane %v3202_v61, 2  ;;  %v3456_v31 = vsel %vm1074_vm4, %v1720_v56, %v1722_v19  ;;  %v2210_v12 = vmul.f32 %v3075_v7, %v3372_v32  ;;  %v1230_v62 = vld [vmem:[#allocation2 + $0x70] sm:$0x3] }
 0x126   : > { %4974 = vst [vmem:[#allocation30_spill] sm:$0xff] %v3456_v31  ;;  %v2211_v46 = vmul.f32 %v3075_v7, %v1847_v45  ;;  %v2461_v43 = vmax.f32 %v2397_v52, %v2429_v60  ;;  %v2076_v59 = vrot.slane %v1966_v13, 1  ;;  %v2078_v18 = vrot.slane %v1967_v51, 1 }
 0x127   : > { %v3453_v10 = vsel %vm1074_vm4, %v4972_v63, %v1720_v56  ;;  %v2460_v39 = vmax.f32 %v2396_v42, %v2428_v57  ;;  %v2320_v61 = vrot.slane %v2210_v12, 2  ;;  %v673_v34 = vmul.f32 %v3031_v28, %v625_v49 }
 0x128   : > { %4973 = vst [vmem:[#allocation29_spill] sm:$0xff] %v3453_v10  ;;  %v2322_v40 = vrot.slane %v2211_v46, 2  ;;  %v3470_v32 = vmul.f32 %v3029_v23, %v625_v49  ;;  %v2789_v50 = vpack.c.bf16 %v2461_v43, %v2461_v43  ;;  %v4975_v2 = vrot.slane %v3209_v48, 1  ;;  %v622_v43 = vld [vmem:[#allocation2 + $0x48] sm:$0xff] }
 0x129   : > { %v2788_v35 = vpack.c.bf16 %v2460_v39, %v2460_v39  ;;  %v3478_v11 = vsel %vm829_vm3, %v2076_v59, %v2078_v18  ;;  %v4978_v16 = vrot.slane %v3212_v17, 2  ;;  %v3489_v45 = vadd.f32 %v3044_v38, %v673_v34 }
 0x12a   : > { %v3475_v21 = vsel %vm829_vm3, %v4975_v2, %v2076_v59  ;;  %4977 = vst [vmem:[#allocation32_spill] sm:$0xff] %v3478_v11  ;;  %v3486_v41 = vsel %vm1074_vm4, %v2320_v61, %v2322_v40  ;;  %2622 = vst.msk [vmem:[%s3466_s5 + $0x4] sm:$0xf] %vm2620_vm5, %v2789_v50  ;;  %v3497_v55 = vmul.f32 %v3033_v29, %v625_v49  ;;  %v4990_v13 = vrot.slane %v3086_v14, 2  ;;  %v4994_v11 = vld [vmem:[#allocation15_spill] sm:$0xff] }
 0x12b   : > { %4976 = vst [vmem:[#allocation31_spill] sm:$0xff] %v3475_v21  ;;  %v3483_v53 = vsel %vm1074_vm4, %v4978_v16, %v2320_v61  ;;  %4980 = vst [vmem:[#allocation34_spill] sm:$0xff] %v3486_v41  ;;  %v3500_v17 = vmul.f32 %v3059_v0, %v625_v49  ;;  %v3503_v42 = vmul.f32 %v3064_v3, %v625_v49  ;;  %v4989_v16 = vrot.slane %v3222_v58, 2  ;;  %v4997_v21 = vld [vmem:[#allocation3_spill] sm:$0xff] }
 0x12c   : > { %4979 = vst [vmem:[#allocation33_spill] sm:$0xff] %v3483_v53  ;;  %4981 = vst [vmem:[#allocation35_spill] sm:$0xff] %v3489_v45  ;;  %v3506_v52 = vmul.f32 %v3066_v4, %v625_v49  ;;  %v3509_v9 = vmul.f32 %v3068_v5, %v625_v49  ;;  %v3512_v56 = vmul.f32 %v3070_v6, %v625_v49  ;;  %v4991_v58 = vrot.slane %v3239_v30, 2 }
 0x12d   : > { %2621 = vst.msk [vmem:[%s3466_s5] sm:$0xf] %vm2620_vm5, %v2788_v35  ;;  %4982 = vst [vmem:[#allocation36_spill] sm:$0xff] %v3497_v55  ;;  %v3515_v19 = vmul.f32 %v3075_v7, %v625_v49  ;;  %v689_v57 = vmul.f32 %v3031_v28, %v649_v33  ;;  %v3522_v63 = vmul.f32 %v3029_v23, %v649_v33  ;;  %v4992_v14 = vrot.slane %v3096_v20, 2  ;;  %v4995_v20 = vld [vmem:[#allocation14_spill] sm:$0xff] }
 0x12e   : > { %4983 = vst [vmem:[#allocation37_spill] sm:$0xff] %v3500_v17  ;;  %4984 = vst [vmem:[#allocation38_spill] sm:$0xff] %v3506_v52  ;;  %v3530_v49 = vmul.f32 %v3033_v29, %v649_v33  ;;  %v3534_v18 = vmul.f32 %v3059_v0, %v649_v33  ;;  %v3537_v61 = vmul.f32 %v3064_v3, %v649_v33  ;;  %v4996_v30 = vrot.slane %v4995_v20, 2  ;;  %v650_v52 = vld [vmem:[#allocation2 + $0x128] sm:$0xff] }
 0x12f   : > { %v3527_v39 = vadd.f32 %v3044_v38, %v689_v57  ;;  %v3540_v40 = vmul.f32 %v3066_v4, %v649_v33  ;;  %v3544_v35 = vmul.f32 %v3068_v5, %v649_v33  ;;  %v3547_v50 = vmul.f32 %v3070_v6, %v649_v33 }
 0x130   : > { %4986 = vst [vmem:[#allocation40_spill] sm:$0xff] %v3530_v49  ;;  %4987 = vst [vmem:[#allocation41_spill] sm:$0xff] %v3534_v18  ;;  %v3550_v2 = vmul.f32 %v3075_v7, %v649_v33  ;;  %v671_v51 = vmul.f32 %v3031_v28, %v622_v43  ;;  %v3556_v60 = vmul.f32 %v3029_v23, %v622_v43  ;;  %v4998_v1 = vrot.slane %v4997_v21, 2  ;;  %v1832_v49 = vld [vmem:[#allocation2 + $0x70] sm:$0x3] }
 0x131   : > { %4985 = vst [vmem:[#allocation39_spill] sm:$0xff] %v3527_v39  ;;  %4988 = vst [vmem:[#allocation42_spill] sm:$0xff] %v3540_v40  ;;  %v946_v46 = vadd.f32 %v3236_v36, %v3107_v26  ;;  %v3563_v12 = vmul.f32 %v3033_v29, %v622_v43  ;;  %v1087_v48 = vsel %vm1074_vm4, %v4990_v13, %v4989_v16  ;;  %v5000_v21 = vrot.slane %v3312_v37, 2 }
 0x132   : > { %v3566_v33 = vadd.f32 %v3044_v38, %v671_v51  ;;  %v1275_v34 = vmul.f32 %v3059_v0, %v622_v43  ;;  %v1305_v26 = vadd.f32 %v3089_v15, %v3379_v44  ;;  %v3579_v36 = vmul.f32 %v3064_v3, %v622_v43  ;;  %v646_v51 = vld [vmem:[#allocation2 + $0x108] sm:$0xff] }
 0x133   : > { %v1191_v41 = vadd.f32 %v1087_v48, %v946_v46  ;;  %v3582_v57 = vmul.f32 %v3066_v4, %v622_v43  ;;  %v1686_v13 = vsel %vm1074_vm4, %v4992_v14, %v4991_v58  ;;  %v1878_v16 = vmul.f32 %v3068_v5, %v622_v43 }
 0x134   : > { %v3591_v48 = vmul.f32 %v3070_v6, %v622_v43  ;;  %v1549_v44 = vadd.f32 %v3257_v47, %v1305_v26  ;;  %v3598_v59 = vmul.f32 %v3075_v7, %v622_v43  ;;  %v687_v58 = vmul.f32 %v3031_v28, %v646_v51 }
 0x135   : > { %v3593_v46 = vadd.f32 %v1275_v34, %v1191_v41  ;;  %v3604_v14 = vmul.f32 %v3029_v23, %v646_v51  ;;  %v4993_v34 = vld [vmem:[#allocation5_spill] sm:$0xff]  ;;  %v3610_v47 = vmul.f32 %v3033_v29, %v646_v51  ;;  %v1127_v31 = vsel %vm1074_vm4, %v4998_v1, %v4996_v30  ;;  %v4999_v41 = vld [vmem:[#allocation4_spill] sm:$0xff]  ;;  %v5001_v1 = vld [vmem:[#allocation6_spill] sm:$0xff] }
 0x136   : > { %v1793_v53 = vadd.f32 %v1686_v13, %v1549_v44  ;;  %v962_v15 = vadd.f32 %v4994_v11, %v4993_v34  ;;  %v3613_v43 = vadd.f32 %v3044_v38, %v687_v58  ;;  %v1291_v13 = vmul.f32 %v3059_v0, %v646_v51  ;;  %v626_v58 = vld [vmem:[#allocation2 + $0x68] sm:$0xff]  ;;  %v627_v11 = vld [vmem:[#allocation2 + $0x70] sm:$0x3] }
 0x137   : > { %v1321_v10 = vadd.f32 %v4999_v41, %v3424_v22  ;;  %v3628_v25 = vmul.f32 %v3064_v3, %v646_v51  ;;  %v3631_v20 = vmul.f32 %v3066_v4, %v646_v51  ;;  %v5002_v30 = vrot.slane %v5001_v1, 2 }
 0x138   : > { %v3622_v44 = vadd.f32 %v1878_v16, %v1793_v53  ;;  %v1207_v34 = vadd.f32 %v1127_v31, %v962_v15  ;;  %v1894_v16 = vmul.f32 %v3068_v5, %v646_v51  ;;  %v2853_v31 = vpop.f32.mrb[12].mxu0  ;;  %v3643_v41 = vmul.f32 %v3070_v6, %v646_v51 }
 0x139   : > { %v1726_v53 = vsel %vm1074_vm4, %v5002_v30, %v5000_v21  ;;  %v1565_v22 = vadd.f32 %v3329_v24, %v1321_v10  ;;  %v3646_v26 = vmul.f32 %v3075_v7, %v646_v51  ;;  %585 = vst.msk [vmem:[#allocation2 + $0xc1] sm:$0xff] %vm319_vm0, %v2853_v31  ;;  %v674_v1 = vmul.f32 %v3031_v28, %v626_v58  ;;  %v2869_v51 = vpop.f32.mrb[12].mxu1 }
 0x13a   : > { %v3639_v15 = vadd.f32 %v1291_v13, %v1207_v34  ;;  %v746_v30 = vmul.f32 %v3029_v23, %v626_v58  ;;  %v747_v10 = vmul.f32 %v3029_v23, %v627_v11  ;;  %v3658_v37 = vmul.f32 %v3033_v29, %v626_v58  ;;  %601 = vst.msk [vmem:[#allocation2 + $0x181] sm:$0xff] %vm319_vm0, %v2869_v51 }
 0x13b   : > { %v1809_v13 = vadd.f32 %v1726_v53, %v1565_v22  ;;  %v706_v8 = vadd.f32 %v3044_v38, %v674_v1  ;;  %v992_v21 = vmul.f32 %v3033_v29, %v627_v11  ;;  %v3665_v22 = vmul.f32 %v3059_v0, %v626_v58 }
 0x13c   : > { %v851_v31 = vrot.slane %v746_v30, 1  ;;  %5003 = vst [vmem:[#allocation5_spill] sm:$0xff] %v3658_v37  ;;  %v853_v53 = vrot.slane %v747_v10, 1  ;;  %v1349_v24 = vmul.f32 %v3064_v3, %v626_v58  ;;  %v5004_v34 = vrot.slane %v3470_v32, 1 }
 0x13d   : > { %v3662_v40 = vadd.f32 %v1894_v16, %v1809_v13  ;;  %v4909_v30 = vrot.slane %v3658_v37, 2  ;;  %v1098_v18 = vrot.slane %v992_v21, 2  ;;  %v1350_v11 = vmul.f32 %v3064_v3, %v1230_v62 }
 0x13e   : > { %v3671_v1 = vsel %vm829_vm3, %v5004_v34, %v851_v31  ;;  %v854_v51 = vsel %vm829_vm3, %v851_v31, %v853_v53  ;;  %v1451_v16 = vrot.slane %v1349_v24, 1  ;;  %v3677_v13 = vmul.f32 %v3066_v4, %v626_v58  ;;  %v450_v31 = vpop.f32.mrb[13].mxu0 }
 0x13f   : > { %5005 = vst [vmem:[#allocation15_spill] sm:$0xff] %v3671_v1  ;;  %v1594_v10 = vmul.f32 %v3066_v4, %v1230_v62  ;;  %v3680_v39 = vadd.f32 %v854_v51, %v706_v8  ;;  %v3685_v32 = vsel %vm1074_vm4, %v4909_v30, %v1098_v18  ;;  %v1453_v34 = vrot.slane %v1350_v11, 1  ;;  %583 = vst.msk [vmem:[#allocation2 + $0xa9] sm:$0xff] %vm319_vm0, %v450_v31 }
 0x140   : > { %5006 = vst [vmem:[#allocation14_spill] sm:$0xff] %v3677_v13  ;;  %5008 = vst [vmem:[#allocation4_spill] sm:$0xff] %v3685_v32  ;;  %v3688_v21 = vmul.f32 %v3068_v5, %v626_v58  ;;  %v5009_v24 = vrot.slane %v3503_v42, 1  ;;  %v4911_v62 = vrot.slane %v3677_v13, 2  ;;  %v1951_v51 = vmul.f32 %v3070_v6, %v626_v58 }
 0x141   : > { %5007 = vst [vmem:[#allocation3_spill] sm:$0xff] %v3680_v39  ;;  %v1697_v8 = vrot.slane %v1594_v10, 2  ;;  %v651_v39 = vld [vmem:[#allocation2 + $0x130] sm:$0x3]  ;;  %v3699_v18 = vsel %vm829_vm3, %v1451_v16, %v1453_v34  ;;  %v1952_v11 = vmul.f32 %v3070_v6, %v1832_v49  ;;  %v2195_v30 = vmul.f32 %v3075_v7, %v626_v58 }
 0x142   : > { %v3693_v53 = vsel %vm829_vm3, %v5009_v24, %v1451_v16  ;;  %5011 = vst [vmem:[#allocation43_spill] sm:$0xff] %v3699_v18  ;;  %v2196_v42 = vmul.f32 %v3075_v7, %v1832_v49  ;;  %v2051_v10 = vrot.slane %v1951_v51, 1  ;;  %v690_v32 = vmul.f32 %v3031_v28, %v650_v52  ;;  %v1254_v51 = vld [vmem:[#allocation2 + $0x130] sm:$0x3] }
 0x143   : > { %5010 = vst [vmem:[#allocation6_spill] sm:$0xff] %v3693_v53  ;;  %v3707_v24 = vsel %vm1074_vm4, %v4911_v62, %v1697_v8  ;;  %v770_v53 = vmul.f32 %v3029_v23, %v650_v52  ;;  %v2053_v31 = vrot.slane %v1952_v11, 1  ;;  %v2295_v17 = vrot.slane %v2195_v30, 2 }
 0x144   : > { %5012 = vst [vmem:[#allocation44_spill] sm:$0xff] %v3707_v24  ;;  %v2297_v16 = vrot.slane %v2196_v42, 2  ;;  %v771_v34 = vmul.f32 %v3029_v23, %v651_v39  ;;  %v5013_v18 = vrot.slane %v3512_v56, 1  ;;  %v722_v49 = vadd.f32 %v3044_v38, %v690_v32  ;;  %v514_v42 = vpop.f32.mrb[13].mxu1 }
 0x145   : > { %v891_v13 = vrot.slane %v770_v53, 1  ;;  %v3719_v8 = vmul.f32 %v3033_v29, %v650_v52  ;;  %v3722_v62 = vsel %vm829_vm3, %v2051_v10, %v2053_v31  ;;  %v5015_v30 = vrot.slane %v3515_v19, 2  ;;  %599 = vst.msk [vmem:[#allocation2 + $0x169] sm:$0xff] %vm319_vm0, %v514_v42 }
 0x146   : > { %v3715_v58 = vsel %vm829_vm3, %v5013_v18, %v2051_v10  ;;  %v3730_v56 = vsel %vm1074_vm4, %v2295_v17, %v2297_v16  ;;  %v893_v18 = vrot.slane %v771_v34, 1  ;;  %v5016_v38 = vrot.slane %v3522_v63, 1  ;;  %v1856_v34 = vld [vmem:[#allocation2 + $0x130] sm:$0x3] }
 0x147   : > { %5014 = vst [vmem:[#allocation45_spill] sm:$0xff] %v3719_v8  ;;  %v3727_v11 = vsel %vm1074_vm4, %v5015_v30, %v2295_v17  ;;  %v1016_v53 = vmul.f32 %v3033_v29, %v651_v39  ;;  %v3740_v31 = vmul.f32 %v3059_v0, %v650_v52  ;;  %v1373_v17 = vmul.f32 %v3064_v3, %v650_v52 }
 0x148   : > { %v3735_v32 = vsel %vm829_vm3, %v5016_v38, %v891_v13  ;;  %v894_v19 = vsel %vm829_vm3, %v891_v13, %v893_v18  ;;  %v1374_v16 = vmul.f32 %v3064_v3, %v1254_v51  ;;  %v3747_v63 = vmul.f32 %v3066_v4, %v650_v52 }
 0x149   : > { %5017 = vst [vmem:[#allocation46_spill] sm:$0xff] %v3735_v32  ;;  %v3749_v30 = vadd.f32 %v894_v19, %v722_v49  ;;  %v1138_v39 = vrot.slane %v1016_v53, 2  ;;  %v1618_v38 = vmul.f32 %v3066_v4, %v1254_v51  ;;  %v3753_v10 = vmul.f32 %v3068_v5, %v650_v52  ;;  %v3757_v32 = vld [vmem:[#allocation2 + $0x50] sm:$0xff]  ;;  %v624_v19 = vld [vmem:[#allocation2 + $0x58] sm:$0x3] }
 0x14a   : > { %5018 = vst [vmem:[#allocation47_spill] sm:$0xff] %v3747_v63  ;;  %v1491_v24 = vrot.slane %v1373_v17, 1  ;;  %v1493_v42 = vrot.slane %v1374_v16, 1  ;;  %v1975_v18 = vmul.f32 %v3070_v6, %v650_v52  ;;  %v5020_v55 = vrot.slane %v3719_v8, 2 }
 0x14b   : > { %5019 = vst [vmem:[#allocation48_spill] sm:$0xff] %v3749_v30  ;;  %v1737_v49 = vrot.slane %v1618_v38, 2  ;;  %v1976_v53 = vmul.f32 %v3070_v6, %v1856_v34  ;;  %v2219_v51 = vmul.f32 %v3075_v7, %v650_v52  ;;  %v5022_v17 = vrot.slane %v3537_v61, 1 }
 0x14c   : > { %v3762_v37 = vsel %vm1074_vm4, %v5020_v55, %v1138_v39  ;;  %v3772_v13 = vsel %vm829_vm3, %v1491_v24, %v1493_v42  ;;  %v2091_v30 = vrot.slane %v1975_v18, 1  ;;  %v2220_v8 = vmul.f32 %v3075_v7, %v1856_v34  ;;  %v2854_v34 = vpop.f32.mrb[14].mxu0 }
 0x14d   : > { %5021 = vst [vmem:[#allocation49_spill] sm:$0xff] %v3762_v37  ;;  %v3769_v16 = vsel %vm829_vm3, %v5022_v17, %v1491_v24  ;;  %5024 = vst [vmem:[#allocation51_spill] sm:$0xff] %v3772_v13  ;;  %v5025_v55 = vrot.slane %v3747_v63, 2  ;;  %v2093_v38 = vrot.slane %v1976_v53, 1  ;;  %v2335_v37 = vrot.slane %v2219_v51, 2  ;;  %v5033_v13 = vld [vmem:[#allocation11_spill] sm:$0xff] }
 0x14e   : > { %5023 = vst [vmem:[#allocation50_spill] sm:$0xff] %v3769_v16  ;;  %v672_v52 = vmul.f32 %v3031_v28, %v3757_v32  ;;  %v5027_v61 = vrot.slane %v3547_v50, 1  ;;  %v2337_v24 = vrot.slane %v2220_v8, 2  ;;  %v743_v42 = vmul.f32 %v3029_v23, %v3757_v32  ;;  %v3801_v50 = vld [vmem:[%s4899_s3] ss:$0 sm:$0xff]  ;;  %586 = vst.msk [vmem:[#allocation2 + $0xc9] sm:$0xff] %vm319_vm0, %v2854_v34 }
 0x14f   : > { %v3778_v39 = vsel %vm1074_vm4, %v5025_v55, %v1737_v49  ;;  %v744_v7 = vmul.f32 %v3029_v23, %v624_v19  ;;  %v3791_v18 = vsel %vm829_vm3, %v2091_v30, %v2093_v38  ;;  %v5029_v49 = vrot.slane %v3550_v2, 2  ;;  %v1227_v55 = vld [vmem:[#allocation2 + $0x58] sm:$0x3] }
 0x150   : > { %5026 = vst [vmem:[#allocation52_spill] sm:$0xff] %v3778_v39  ;;  %v3785_v17 = vsel %vm829_vm3, %v5027_v61, %v2091_v30  ;;  %5028 = vst [vmem:[#allocation53_spill] sm:$0xff] %v3791_v18  ;;  %v704_v8 = vadd.f32 %v3801_v50, %v672_v52  ;;  %v988_v51 = vmul.f32 %v3033_v29, %v3757_v32  ;;  %v846_v2 = vrot.slane %v743_v42, 1  ;;  %v5032_v39 = vld [vmem:[#allocation10_spill] sm:$0xff] }
 0x151   : > { %v3796_v53 = vsel %vm1074_vm4, %v5029_v49, %v2335_v37  ;;  %v3808_v30 = vsel %vm1074_vm4, %v2335_v37, %v2337_v24  ;;  %v848_v38 = vrot.slane %v744_v7, 1  ;;  %v989_v61 = vmul.f32 %v3033_v29, %v624_v19 }
 0x152   : > { %5030 = vst [vmem:[#allocation54_spill] sm:$0xff] %v3796_v53  ;;  %5031 = vst [vmem:[#allocation55_spill] sm:$0xff] %v3808_v30  ;;  %v1091_v49 = vrot.slane %v988_v51, 2  ;;  %v1192_v16 = vadd.f32 %v5033_v13, %v5032_v39  ;;  %v1276_v52 = vmul.f32 %v3059_v0, %v3757_v32  ;;  %v1346_v63 = vmul.f32 %v3064_v3, %v3757_v32 }
 0x153   : > { %v5034_v1 = vrot.slane %v3556_v60, 1  ;;  %v849_v37 = vsel %vm829_vm3, %v846_v2, %v848_v38  ;;  %v1093_v24 = vrot.slane %v989_v61, 2  ;;  %v1347_v42 = vmul.f32 %v3064_v3, %v1227_v55  ;;  %v5036_v60 = vld [vmem:[#allocation12_spill] sm:$0xff] }
 0x154   : > { %v949_v7 = vadd.f32 %v849_v37, %v704_v8  ;;  %v5035_v13 = vrot.slane %v3563_v12, 2  ;;  %v1308_v51 = vadd.f32 %v1276_v52, %v1192_v16  ;;  %v1446_v30 = vrot.slane %v1346_v63, 1  ;;  %v1829_v8 = vld [vmem:[#allocation2 + $0x58] sm:$0x3]  ;;  %v5038_v63 = vld [vmem:[#allocation13_spill] sm:$0xff]  ;;  %v3841_v52 = vld [vmem:[#allocation2 + $0x110] sm:$0xff] }
 0x155   : > { %v847_v34 = vsel %vm829_vm3, %v5034_v1, %v846_v2  ;;  %v1094_v45 = vsel %vm1074_vm4, %v1091_v49, %v1093_v24  ;;  %v1448_v53 = vrot.slane %v1347_v42, 1  ;;  %v1550_v1 = vadd.f32 %v5036_v60, %v3393_v27 }
 0x156   : > { %v948_v19 = vadd.f32 %v847_v34, %v3566_v33  ;;  %v1092_v39 = vsel %vm1074_vm4, %v5035_v13, %v1091_v49  ;;  %v1194_v2 = vadd.f32 %v1094_v45, %v949_v7  ;;  %v1590_v38 = vmul.f32 %v3066_v4, %v3757_v32  ;;  %v2870_v45 = vpop.f32.mrb[14].mxu1 }
 0x157   : > { %v1591_v33 = vmul.f32 %v3066_v4, %v1227_v55  ;;  %v5037_v12 = vrot.slane %v3579_v36, 1  ;;  %v1449_v61 = vsel %vm829_vm3, %v1446_v30, %v1448_v53  ;;  %v1794_v49 = vadd.f32 %v5038_v63, %v1550_v1  ;;  %602 = vst.msk [vmem:[#allocation2 + $0x189] sm:$0xff] %vm319_vm0, %v2870_v45 }
 0x158   : > { %v3829_v18 = vadd.f32 %v1092_v39, %v948_v19  ;;  %v1879_v27 = vmul.f32 %v3068_v5, %v3757_v32  ;;  %v3844_v34 = vadd.f32 %v3665_v22, %v1194_v2  ;;  %v1552_v37 = vadd.f32 %v1449_v61, %v1308_v51  ;;  %v3857_v22 = vld [vmem:[%s4898_s2 + $0x8] ss:$0 sm:$0xff] }
 0x159   : > { %v1447_v16 = vsel %vm829_vm3, %v5037_v12, %v1446_v30  ;;  %v1690_v24 = vrot.slane %v1590_v38, 2  ;;  %v1692_v36 = vrot.slane %v1591_v33, 2  ;;  %v1948_v53 = vmul.f32 %v3070_v6, %v3757_v32  ;;  %v648_v12 = vld [vmem:[#allocation2 + $0x118] sm:$0x3] }
 0x15a   : > { %v1551_v55 = vadd.f32 %v1447_v16, %v3593_v46  ;;  %v1911_v42 = vadd.f32 %v1879_v27, %v1794_v49  ;;  %v1949_v30 = vmul.f32 %v3070_v6, %v1829_v8  ;;  %v5039_v19 = vrot.slane %v3582_v57, 2 }
 0x15b   : > { %v2192_v46 = vmul.f32 %v3857_v22, %v3757_v32  ;;  %v2193_v13 = vmul.f32 %v3857_v22, %v1829_v8  ;;  %v688_v39 = vmul.f32 %v3031_v28, %v3841_v52  ;;  %v1693_v51 = vsel %vm1074_vm4, %v1690_v24, %v1692_v36 }
 0x15c   : > { %v1691_v7 = vsel %vm1074_vm4, %v5039_v19, %v1690_v24  ;;  %v2046_v1 = vrot.slane %v1948_v53, 1  ;;  %v2048_v57 = vrot.slane %v1949_v30, 1  ;;  %v1796_v2 = vadd.f32 %v1693_v51, %v1552_v37 }
 0x15d   : > { %v1795_v60 = vadd.f32 %v1691_v7, %v1551_v55  ;;  %v2290_v38 = vrot.slane %v2192_v46, 2  ;;  %v2292_v33 = vrot.slane %v2193_v13, 2  ;;  %v720_v16 = vadd.f32 %v3801_v50, %v688_v39 }
 0x15e   : > { %v5040_v32 = vrot.slane %v3591_v48, 1  ;;  %v2049_v63 = vsel %vm829_vm3, %v2046_v1, %v2048_v57  ;;  %v767_v49 = vmul.f32 %v3029_v23, %v3841_v52  ;;  %v1913_v27 = vadd.f32 %v3688_v21, %v1796_v2 }
 0x15f   : > { %v1912_v61 = vadd.f32 %v3509_v9, %v1795_v60  ;;  %v2155_v55 = vadd.f32 %v2049_v63, %v1911_v42  ;;  %v5041_v37 = vrot.slane %v3598_v59, 2  ;;  %v2293_v48 = vsel %vm1074_vm4, %v2290_v38, %v2292_v33  ;;  %v5044_v63 = vld [vmem:[#allocation16_spill] sm:$0xff] }
 0x160   : > { %v2047_v8 = vsel %vm829_vm3, %v5040_v32, %v2046_v1  ;;  %v768_v36 = vmul.f32 %v3029_v23, %v648_v12  ;;  %v886_v53 = vrot.slane %v767_v49, 1  ;;  %v2157_v30 = vadd.f32 %v3722_v62, %v1913_v27  ;;  %v1251_v27 = vld [vmem:[#allocation2 + $0x118] sm:$0x3] }
 0x161   : > { %v2154_v45 = vadd.f32 %v2047_v8, %v3622_v44  ;;  %v2291_v24 = vsel %vm1074_vm4, %v5041_v37, %v2290_v38  ;;  %v2156_v9 = vadd.f32 %v3715_v58, %v1912_v61  ;;  %v2399_v7 = vadd.f32 %v2293_v48, %v2155_v55  ;;  %v453_v44 = vpop.f32.mrb[15].mxu0 }
 0x162   : > { %v1012_v21 = vmul.f32 %v3033_v29, %v3841_v52  ;;  %v5042_v59 = vrot.slane %v3604_v14, 1  ;;  %v888_v58 = vrot.slane %v768_v36, 1  ;;  %v1013_v13 = vmul.f32 %v3033_v29, %v648_v12  ;;  %584 = vst.msk [vmem:[#allocation2 + $0xb1] sm:$0xff] %vm319_vm0, %v453_v44 }
 0x163   : > { %v2398_v19 = vadd.f32 %v2291_v24, %v2154_v45  ;;  %v2400_v42 = vadd.f32 %v3727_v11, %v2156_v9  ;;  %v2401_v39 = vadd.f32 %v3730_v56, %v2157_v30  ;;  %v2431_v51 = vmul.f32 0.2, %v2399_v7  ;;  %v5046_v30 = vld [vmem:[#allocation19_spill] sm:$0xff] }
 0x164   : > { %v887_v46 = vsel %vm829_vm3, %v5042_v59, %v886_v53  ;;  %v889_v57 = vsel %vm829_vm3, %v886_v53, %v888_v58  ;;  %v1131_v2 = vrot.slane %v1012_v21, 2  ;;  %v1133_v11 = vrot.slane %v1013_v13, 2  ;;  %v1853_v21 = vld [vmem:[#allocation2 + $0x118] sm:$0x3] }
 0x165   : > { %v2430_v62 = vmul.f32 0.2, %v2398_v19  ;;  %v964_v60 = vadd.f32 %v887_v46, %v3613_v43  ;;  %v2432_v1 = vmul.f32 0.2, %v2400_v42  ;;  %v2433_v38 = vmul.f32 0.2, %v2401_v39 }
 0x166   : > { %v2463_v33 = vmax.f32 %v2399_v7, %v2431_v51  ;;  %v965_v61 = vadd.f32 %v889_v57, %v720_v16  ;;  %v5043_v32 = vrot.slane %v3610_v47, 2  ;;  %v1134_v8 = vsel %vm1074_vm4, %v1131_v2, %v1133_v11  ;;  %v5045_v43 = vld [vmem:[#allocation18_spill] sm:$0xff] }
 0x167   : > { %v2462_v14 = vmax.f32 %v2398_v19, %v2430_v62  ;;  %v2464_v12 = vmax.f32 %v2400_v42, %v2432_v1  ;;  %v1208_v49 = vadd.f32 %v5045_v43, %v5044_v63  ;;  %v2465_v45 = vmax.f32 %v2401_v39, %v2433_v38  ;;  %v5047_v39 = vld [vmem:[#allocation20_spill] sm:$0xff] }
 0x168   : > { %v1132_v56 = vsel %vm1074_vm4, %v5043_v32, %v1131_v2  ;;  %v2791_v37 = vpack.c.bf16 %v2463_v33, %v2463_v33  ;;  %v1210_v16 = vadd.f32 %v1134_v8, %v965_v61  ;;  %v1292_v47 = vmul.f32 %v3059_v0, %v3841_v52  ;;  %v631_v2 = vld [vmem:[#allocation2 + $0x90] sm:$0xff] }
 0x169   : > { %v2790_v55 = vpack.c.bf16 %v2462_v14, %v2462_v14  ;;  %v3899_v24 = vadd.f32 %v1132_v56, %v964_v60  ;;  %v2792_v9 = vpack.c.bf16 %v2464_v12, %v2464_v12  ;;  %v1370_v48 = vmul.f32 %v3064_v3, %v3841_v52 }
 0x16a   : > { %v2793_v36 = vpack.c.bf16 %v2465_v45, %v2465_v45  ;;  %2624 = vst.msk [vmem:[%s3466_s5 + $0xc] sm:$0xf] %vm2620_vm5, %v2791_v37  ;;  %v1371_v53 = vmul.f32 %v3064_v3, %v1251_v27  ;;  %v1566_v19 = vadd.f32 %v5046_v30, %v3442_v54  ;;  %v1614_v7 = vmul.f32 %v3066_v4, %v3841_v52 }
 0x16b   : > { %2623 = vst.msk [vmem:[%s3466_s5 + $0x8] sm:$0xf] %vm2620_vm5, %v2790_v55  ;;  %2625 = vst.msk [vmem:[%s3466_s5 + $0x10] sm:$0xf] %vm2620_vm5, %v2792_v9  ;;  %v1324_v44 = vadd.f32 %v1292_v47, %v1208_v49  ;;  %v3917_v42 = vadd.f32 %v3740_v31, %v1210_v16  ;;  %v1486_v59 = vrot.slane %v1370_v48, 1  ;;  %v1615_v46 = vmul.f32 %v3066_v4, %v1251_v27 }
 0x16c   : > { %2626 = vst.msk [vmem:[%s3466_s5 + $0x14] sm:$0xf] %vm2620_vm5, %v2793_v36  ;;  %v1488_v58 = vrot.slane %v1371_v53, 1  ;;  %v1730_v13 = vrot.slane %v1614_v7, 2  ;;  %v1810_v62 = vadd.f32 %v5047_v39, %v1566_v19  ;;  %v1895_v54 = vmul.f32 %v3068_v5, %v3841_v52  ;;  %v517_v53 = vpop.f32.mrb[15].mxu1 }
 0x16d   : > { %v5048_v51 = vrot.slane %v3628_v25, 1  ;;  %v1732_v1 = vrot.slane %v1615_v46, 2  ;;  %v1972_v31 = vmul.f32 %v3070_v6, %v3841_v52  ;;  %v1973_v57 = vmul.f32 %v3070_v6, %v1853_v21  ;;  %600 = vst.msk [vmem:[#allocation2 + $0x171] sm:$0xff] %vm319_vm0, %v517_v53 }
 0x16e   : > { %v1489_v11 = vsel %vm829_vm3, %v1486_v59, %v1488_v58  ;;  %v5049_v14 = vrot.slane %v3631_v20, 2  ;;  %v1927_v61 = vadd.f32 %v1895_v54, %v1810_v62  ;;  %v2216_v63 = vmul.f32 %v3857_v22, %v3841_v52  ;;  %v655_v62 = vld [vmem:[#allocation2 + $0x150] sm:$0xff] }
 0x16f   : > { %v1487_v60 = vsel %vm829_vm3, %v5048_v51, %v1486_v59  ;;  %v1568_v12 = vadd.f32 %v1489_v11, %v1324_v44  ;;  %v1733_v25 = vsel %vm1074_vm4, %v1730_v13, %v1732_v1  ;;  %v2086_v32 = vrot.slane %v1972_v31, 1  ;;  %v5058_v54 = vld [vmem:[#allocation55_spill] sm:$0xff] }
 0x170   : > { %v1567_v38 = vadd.f32 %v1487_v60, %v3639_v15  ;;  %v1731_v33 = vsel %vm1074_vm4, %v5049_v14, %v1730_v13  ;;  %v2088_v56 = vrot.slane %v1973_v57, 1  ;;  %v2217_v43 = vmul.f32 %v3857_v22, %v1853_v21 }
 0x171   : > { %v677_v49 = vmul.f32 %v3031_v28, %v631_v2  ;;  %v1812_v27 = vadd.f32 %v1733_v25, %v1568_v12  ;;  %v5050_v15 = vrot.slane %v3643_v41, 1  ;;  %v3946_v55 = vmul.f32 %v3029_v23, %v631_v2 }
 0x172   : > { %v1811_v8 = vadd.f32 %v1731_v33, %v1567_v38  ;;  %v2089_v45 = vsel %vm829_vm3, %v2086_v32, %v2088_v56  ;;  %v2330_v52 = vrot.slane %v2216_v63, 2  ;;  %v2332_v48 = vrot.slane %v2217_v43, 2 }
 0x173   : > { %v2087_v20 = vsel %vm829_vm3, %v5050_v15, %v2086_v32  ;;  %v2171_v16 = vadd.f32 %v2089_v45, %v1927_v61  ;;  %v1929_v47 = vadd.f32 %v3753_v10, %v1812_v27  ;;  %v3952_v36 = vadd.f32 %v3801_v50, %v677_v49  ;;  %v5055_v10 = vld [vmem:[#allocation53_spill] sm:$0xff] }
 0x174   : > { %v1928_v37 = vadd.f32 %v3544_v35, %v1811_v8  ;;  %v2170_v9 = vadd.f32 %v2087_v20, %v3662_v40  ;;  %v5052_v19 = vrot.slane %v3646_v26, 2  ;;  %v3960_v35 = vmul.f32 %v3033_v29, %v631_v2  ;;  %v5056_v26 = vld [vmem:[#allocation54_spill] sm:$0xff] }
 0x175   : > { %5051 = vst [vmem:[#allocation10_spill] sm:$0xff] %v3952_v36  ;;  %v3963_v40 = vmul.f32 %v3059_v0, %v631_v2  ;;  %v2173_v21 = vadd.f32 %v5055_v10, %v1929_v47  ;;  %v2333_v44 = vsel %vm1074_vm4, %v2330_v52, %v2332_v48  ;;  %v3969_v46 = vmul.f32 %v3064_v3, %v631_v2 }
 0x176   : > { %v2172_v30 = vadd.f32 %v3785_v17, %v1928_v37  ;;  %v2331_v7 = vsel %vm1074_vm4, %v5052_v19, %v2330_v52  ;;  %5053 = vst [vmem:[#allocation11_spill] sm:$0xff] %v3960_v35  ;;  %v2415_v17 = vadd.f32 %v2333_v44, %v2171_v16  ;;  %v3974_v39 = vmul.f32 %v3066_v4, %v631_v2  ;;  %v4229_v35 = vld [vmem:[#allocation2 + $0x80] sm:$0xff] }
 0x177   : > { %5054 = vst [vmem:[#allocation12_spill] sm:$0xff] %v3963_v40  ;;  %v2414_v59 = vadd.f32 %v2331_v7, %v2170_v9  ;;  %v2417_v51 = vadd.f32 %v5058_v54, %v2173_v21  ;;  %v3979_v31 = vmul.f32 %v3068_v5, %v631_v2  ;;  %v3983_v14 = vmul.f32 %v3070_v6, %v631_v2  ;;  %v628_v9 = vld [vmem:[#allocation2 + $0x78] sm:$0xff]  ;;  %v5064_v54 = vld [vmem:[#allocation15_spill] sm:$0xff] }
 0x178   : > { %v2416_v58 = vadd.f32 %v5056_v26, %v2172_v30  ;;  %5057 = vst [vmem:[#allocation13_spill] sm:$0xff] %v3974_v39  ;;  %v2447_v57 = vmul.f32 0.2, %v2415_v17  ;;  %v3986_v12 = vmul.f32 %v3857_v22, %v631_v2  ;;  %v693_v25 = vmul.f32 %v3031_v28, %v655_v62  ;;  %v656_v39 = vld [vmem:[#allocation2 + $0x158] sm:$0xff] }
 0x179   : > { %v2446_v60 = vmul.f32 0.2, %v2414_v59  ;;  %v2449_v33 = vmul.f32 0.2, %v2417_v51  ;;  %v3991_v63 = vmul.f32 %v3029_v23, %v655_v62  ;;  %v3999_v37 = vmul.f32 %v3033_v29, %v655_v62 }
 0x17a   : > { %v2448_v11 = vmul.f32 0.2, %v2416_v58  ;;  %v2479_v32 = vmax.f32 %v2415_v17, %v2447_v57  ;;  %v3995_v15 = vadd.f32 %v3801_v50, %v693_v25  ;;  %v4004_v52 = vmul.f32 %v3059_v0, %v655_v62  ;;  %v5079_v57 = vld [vmem:[#allocation40_spill] sm:$0xff] }
 0x17b   : > { %v2478_v61 = vmax.f32 %v2414_v59, %v2446_v60  ;;  %v2481_v43 = vmax.f32 %v2417_v51, %v2449_v33  ;;  %5060 = vst [vmem:[#allocation18_spill] sm:$0xff] %v3999_v37  ;;  %v4007_v47 = vmul.f32 %v3064_v3, %v655_v62  ;;  %v4010_v48 = vmul.f32 %v3066_v4, %v655_v62  ;;  %v1838_v37 = vld [vmem:[#allocation2 + $0xa0] sm:$0x3] }
 0x17c   : > { %v2480_v56 = vmax.f32 %v2416_v58, %v2448_v11  ;;  %5059 = vst [vmem:[#allocation16_spill] sm:$0xff] %v3995_v15  ;;  %v2807_v2 = vpack.c.bf16 %v2479_v32, %v2479_v32  ;;  %5061 = vst [vmem:[#allocation19_spill] sm:$0xff] %v4004_v52  ;;  %v4018_v30 = vmul.f32 %v3068_v5, %v655_v62  ;;  %v5063_v58 = vld [vmem:[#allocation35_spill] sm:$0xff]  ;;  %v5065_v11 = vld [vmem:[#allocation5_spill] sm:$0xff]  ;;  %v5080_v26 = vrot.slane %v5079_v57, 2 }
 0x17d   : > { %v2806_v49 = vpack.c.bf16 %v2478_v61, %v2478_v61  ;;  %v2809_v16 = vpack.c.bf16 %v2481_v43, %v2481_v43  ;;  %5062 = vst [vmem:[#allocation20_spill] sm:$0xff] %v4010_v48  ;;  %v4021_v19 = vmul.f32 %v3070_v6, %v655_v62  ;;  %v4024_v7 = vmul.f32 %v3857_v22, %v655_v62  ;;  %v5067_v61 = vld [vmem:[#allocation36_spill] sm:$0xff]  ;;  %v5076_v43 = vld [vmem:[#allocation46_spill] sm:$0xff]  ;;  %v5082_v57 = vld [vmem:[#allocation47_spill] sm:$0xff] }
 0x17e   : > { %v2808_v20 = vpack.c.bf16 %v2480_v56, %v2480_v56  ;;  %2640 = vst.msk [vmem:[%s3466_s5 + $0x4c] sm:$0xf] %vm2620_vm5, %v2807_v2  ;;  %v675_v44 = vmul.f32 %v3031_v28, %v628_v9  ;;  %v4032_v59 = vmul.f32 %v3029_v23, %v628_v9  ;;  %v950_v51 = vadd.f32 %v5064_v54, %v5063_v58  ;;  %v5069_v2 = vld [vmem:[#allocation37_spill] sm:$0xff]  ;;  %v5070_v54 = vld [vmem:[#allocation14_spill] sm:$0xff] }
 0x17f   : > { %2639 = vst.msk [vmem:[%s3466_s5 + $0x48] sm:$0xf] %vm2620_vm5, %v2806_v49  ;;  %2642 = vst.msk [vmem:[%s3466_s5 + $0x54] sm:$0xf] %vm2620_vm5, %v2809_v16  ;;  %v4039_v62 = vmul.f32 %v3033_v29, %v628_v9  ;;  %v5066_v33 = vrot.slane %v5065_v11, 2  ;;  %v5068_v25 = vrot.slane %v5067_v61, 2  ;;  %v1279_v56 = vmul.f32 %v3059_v0, %v628_v9 }
 0x180   : > { %2641 = vst.msk [vmem:[%s3466_s5 + $0x50] sm:$0xf] %vm2620_vm5, %v2808_v20  ;;  %v4042_v60 = vadd.f32 %v3801_v50, %v675_v44  ;;  %v1309_v20 = vadd.f32 %v5069_v2, %v3829_v18  ;;  %v4055_v16 = vmul.f32 %v3064_v3, %v628_v9  ;;  %v652_v44 = vld [vmem:[#allocation2 + $0x138] sm:$0xff]  ;;  %v4058_v58 = vmul.f32 %v3066_v4, %v628_v9  ;;  %v5072_v61 = vld [vmem:[#allocation38_spill] sm:$0xff] }
 0x181   : > { %v1097_v32 = vsel %vm1074_vm4, %v5068_v25, %v5066_v33  ;;  %v5071_v11 = vrot.slane %v5070_v54, 2  ;;  %v5073_v21 = vrot.slane %v5072_v61, 2  ;;  %v1882_v25 = vmul.f32 %v3068_v5, %v628_v9  ;;  %v5074_v2 = vld [vmem:[#allocation6_spill] sm:$0xff]  ;;  %v5077_v61 = vld [vmem:[#allocation45_spill] sm:$0xff] }
 0x182   : > { %v1195_v49 = vadd.f32 %v1097_v32, %v950_v51  ;;  %v4067_v51 = vmul.f32 %v3070_v6, %v628_v9  ;;  %v1553_v53 = vadd.f32 %v5074_v2, %v1309_v20  ;;  %v4074_v38 = vmul.f32 %v3857_v22, %v628_v9 }
 0x183   : > { %v1696_v33 = vsel %vm1074_vm4, %v5073_v21, %v5071_v11  ;;  %v691_v21 = vmul.f32 %v3031_v28, %v652_v44  ;;  %v4080_v11 = vmul.f32 %v3029_v23, %v652_v44  ;;  %v4086_v20 = vmul.f32 %v3033_v29, %v652_v44 }
 0x184   : > { %v4069_v32 = vadd.f32 %v1279_v56, %v1195_v49  ;;  %v1797_v13 = vadd.f32 %v1696_v33, %v1553_v53  ;;  %v5075_v49 = vld [vmem:[#allocation39_spill] sm:$0xff]  ;;  %v5078_v54 = vrot.slane %v5077_v61, 2  ;;  %v1295_v53 = vmul.f32 %v3059_v0, %v652_v44  ;;  %v5081_v56 = vld [vmem:[#allocation41_spill] sm:$0xff] }
 0x185   : > { %v966_v18 = vadd.f32 %v5076_v43, %v5075_v49  ;;  %v4089_v9 = vadd.f32 %v3801_v50, %v691_v21  ;;  %v1325_v10 = vadd.f32 %v5081_v56, %v3899_v24  ;;  %v632_v21 = vld [vmem:[#allocation2 + $0x98] sm:$0xff]  ;;  %v4104_v45 = vmul.f32 %v3064_v3, %v652_v44  ;;  %v633_v43 = vld [vmem:[#allocation2 + $0xa0] sm:$0x3] }
 0x186   : > { %v1137_v17 = vsel %vm1074_vm4, %v5080_v26, %v5078_v54  ;;  %v4098_v33 = vadd.f32 %v1882_v25, %v1797_v13  ;;  %v4107_v61 = vmul.f32 %v3066_v4, %v652_v44  ;;  %v5083_v2 = vrot.slane %v5082_v57, 2  ;;  %v5084_v26 = vld [vmem:[#allocation42_spill] sm:$0xff] }
 0x187   : > { %v1211_v49 = vadd.f32 %v1137_v17, %v966_v18  ;;  %v5085_v54 = vrot.slane %v5084_v26, 2  ;;  %v1898_v25 = vmul.f32 %v3068_v5, %v652_v44  ;;  %v5086_v18 = vld [vmem:[#allocation50_spill] sm:$0xff]  ;;  %v4119_v56 = vmul.f32 %v3070_v6, %v652_v44 }
 0x188   : > { %v1569_v24 = vadd.f32 %v5086_v18, %v1325_v10  ;;  %v4122_v27 = vmul.f32 %v3857_v22, %v652_v44  ;;  %v678_v26 = vmul.f32 %v3031_v28, %v632_v21  ;;  %v753_v10 = vmul.f32 %v3029_v23, %v633_v43  ;;  %v1236_v18 = vld [vmem:[#allocation2 + $0xa0] sm:$0x3] }
 0x189   : > { %v1736_v13 = vsel %vm1074_vm4, %v5085_v54, %v5083_v2  ;;  %v4115_v17 = vadd.f32 %v1295_v53, %v1211_v49  ;;  %v752_v2 = vmul.f32 %v3029_v23, %v632_v21  ;;  %v4133_v41 = vmul.f32 %v3033_v29, %v632_v21 }
 0x18a   : > { %5087 = vst [vmem:[#allocation53_spill] sm:$0xff] %v4122_v27  ;;  %v1813_v54 = vadd.f32 %v1736_v13, %v1569_v24  ;;  %v710_v1 = vadd.f32 %v3801_v50, %v678_v26  ;;  %v998_v57 = vmul.f32 %v3033_v29, %v633_v43  ;;  %v863_v48 = vrot.slane %v753_v10, 1 }
 0x18b   : > { %v861_v44 = vrot.slane %v752_v2, 1  ;;  %5088 = vst [vmem:[#allocation54_spill] sm:$0xff] %v4133_v41  ;;  %v4139_v13 = vmul.f32 %v3059_v0, %v632_v21  ;;  %v1355_v24 = vmul.f32 %v3064_v3, %v632_v21  ;;  %v5089_v49 = vrot.slane %v3946_v55, 1 }
 0x18c   : > { %v4136_v8 = vadd.f32 %v1898_v25, %v1813_v54  ;;  %v4919_v26 = vrot.slane %v4133_v41, 2  ;;  %v1108_v2 = vrot.slane %v998_v57, 2  ;;  %v1356_v52 = vmul.f32 %v3064_v3, %v1236_v18 }
 0x18d   : > { %v4145_v53 = vsel %vm829_vm3, %v5089_v49, %v861_v44  ;;  %v864_v43 = vsel %vm829_vm3, %v861_v44, %v863_v48  ;;  %v1461_v25 = vrot.slane %v1355_v24, 1  ;;  %v4151_v54 = vmul.f32 %v3066_v4, %v632_v21 }
 0x18e   : > { %5090 = vst [vmem:[#allocation55_spill] sm:$0xff] %v4145_v53  ;;  %v1600_v10 = vmul.f32 %v3066_v4, %v1236_v18  ;;  %v4154_v15 = vadd.f32 %v864_v43, %v710_v1  ;;  %v4159_v55 = vsel %vm1074_vm4, %v4919_v26, %v1108_v2  ;;  %v1463_v49 = vrot.slane %v1356_v52, 1  ;;  %v657_v43 = vld [vmem:[#allocation2 + $0x160] sm:$0x3] }
 0x18f   : > { %5091 = vst [vmem:[#allocation35_spill] sm:$0xff] %v4151_v54  ;;  %5093 = vst [vmem:[#allocation5_spill] sm:$0xff] %v4159_v55  ;;  %v4162_v57 = vmul.f32 %v3068_v5, %v632_v21  ;;  %v5094_v48 = vrot.slane %v3969_v46, 1  ;;  %v4921_v18 = vrot.slane %v4151_v54, 2  ;;  %v1957_v1 = vmul.f32 %v3070_v6, %v632_v21 }
 0x190   : > { %5092 = vst [vmem:[#allocation15_spill] sm:$0xff] %v4154_v15  ;;  %v1707_v24 = vrot.slane %v1600_v10, 2  ;;  %v4172_v15 = vsel %vm829_vm3, %v1461_v25, %v1463_v49  ;;  %v1958_v52 = vmul.f32 %v3070_v6, %v1838_v37  ;;  %v2201_v2 = vmul.f32 %v3857_v22, %v632_v21 }
 0x191   : > { %v4167_v44 = vsel %vm829_vm3, %v5094_v48, %v1461_v25  ;;  %5096 = vst [vmem:[#allocation37_spill] sm:$0xff] %v4172_v15  ;;  %v2202_v26 = vmul.f32 %v3857_v22, %v1838_v37  ;;  %v2061_v48 = vrot.slane %v1957_v1, 1  ;;  %v694_v10 = vmul.f32 %v3031_v28, %v656_v39  ;;  %v1260_v1 = vld [vmem:[#allocation2 + $0x160] sm:$0x3] }
 0x192   : > { %5095 = vst [vmem:[#allocation36_spill] sm:$0xff] %v4167_v44  ;;  %v4180_v46 = vsel %vm1074_vm4, %v4921_v18, %v1707_v24  ;;  %v776_v55 = vmul.f32 %v3029_v23, %v656_v39  ;;  %v2063_v44 = vrot.slane %v1958_v52, 1  ;;  %v2305_v40 = vrot.slane %v2201_v2, 2 }
 0x193   : > { %5097 = vst [vmem:[#allocation14_spill] sm:$0xff] %v4180_v46  ;;  %v2307_v25 = vrot.slane %v2202_v26, 2  ;;  %v777_v49 = vmul.f32 %v3029_v23, %v657_v43  ;;  %v5098_v15 = vrot.slane %v3983_v14, 1  ;;  %v726_v37 = vadd.f32 %v3801_v50, %v694_v10 }
 0x194   : > { %v901_v54 = vrot.slane %v776_v55, 1  ;;  %v4192_v24 = vmul.f32 %v3033_v29, %v656_v39  ;;  %v4195_v18 = vsel %vm829_vm3, %v2061_v48, %v2063_v44  ;;  %v5100_v52 = vrot.slane %v3986_v12, 2 }
 0x195   : > { %v4188_v21 = vsel %vm829_vm3, %v5098_v15, %v2061_v48  ;;  %v4203_v14 = vsel %vm1074_vm4, %v2305_v40, %v2307_v25  ;;  %v903_v15 = vrot.slane %v777_v49, 1  ;;  %v5101_v2 = vrot.slane %v3991_v63, 1  ;;  %v1862_v63 = vld [vmem:[#allocation2 + $0x160] sm:$0x3] }
 0x196   : > { %5099 = vst [vmem:[#allocation38_spill] sm:$0xff] %v4192_v24  ;;  %v4200_v26 = vsel %vm1074_vm4, %v5100_v52, %v2305_v40  ;;  %v1022_v10 = vmul.f32 %v3033_v29, %v657_v43  ;;  %v4213_v44 = vmul.f32 %v3059_v0, %v656_v39  ;;  %v1379_v48 = vmul.f32 %v3064_v3, %v656_v39 }
 0x197   : > { %v4208_v55 = vsel %vm829_vm3, %v5101_v2, %v901_v54  ;;  %v904_v12 = vsel %vm829_vm3, %v901_v54, %v903_v15  ;;  %v1380_v40 = vmul.f32 %v3064_v3, %v1260_v1  ;;  %v4219_v25 = vmul.f32 %v3066_v4, %v656_v39 }
 0x198   : > { %5102 = vst [vmem:[#allocation6_spill] sm:$0xff] %v4208_v55  ;;  %v4221_v49 = vadd.f32 %v904_v12, %v726_v37  ;;  %v1148_v52 = vrot.slane %v1022_v10, 2  ;;  %v1624_v43 = vmul.f32 %v3066_v4, %v1260_v1  ;;  %v4225_v2 = vmul.f32 %v3068_v5, %v656_v39  ;;  %v630_v12 = vld [vmem:[#allocation2 + $0x88] sm:$0x3] }
 0x199   : > { %5103 = vst [vmem:[#allocation39_spill] sm:$0xff] %v4219_v25  ;;  %v1501_v46 = vrot.slane %v1379_v48, 1  ;;  %v1503_v55 = vrot.slane %v1380_v40, 1  ;;  %v1981_v15 = vmul.f32 %v3070_v6, %v656_v39  ;;  %v5105_v41 = vrot.slane %v4192_v24, 2 }
 0x19a   : > { %5104 = vst [vmem:[#allocation46_spill] sm:$0xff] %v4221_v49  ;;  %v1747_v37 = vrot.slane %v1624_v43, 2  ;;  %v1982_v10 = vmul.f32 %v3070_v6, %v1862_v63  ;;  %v2225_v1 = vmul.f32 %v3857_v22, %v656_v39  ;;  %v5107_v48 = vrot.slane %v4007_v47, 1 }
 0x19b   : > { %v4234_v53 = vsel %vm1074_vm4, %v5105_v41, %v1148_v52  ;;  %v4244_v54 = vsel %vm829_vm3, %v1501_v46, %v1503_v55  ;;  %v2101_v49 = vrot.slane %v1981_v15, 1  ;;  %v2226_v24 = vmul.f32 %v3857_v22, %v1862_v63 }
 0x19c   : > { %5106 = vst [vmem:[#allocation45_spill] sm:$0xff] %v4234_v53  ;;  %v4241_v40 = vsel %vm829_vm3, %v5107_v48, %v1501_v46  ;;  %5109 = vst [vmem:[#allocation41_spill] sm:$0xff] %v4244_v54  ;;  %v5110_v41 = vrot.slane %v4219_v25, 2  ;;  %v2103_v43 = vrot.slane %v1982_v10, 1  ;;  %v2345_v53 = vrot.slane %v2225_v1, 2  ;;  %v5118_v25 = vld [vmem:[#allocation4_spill] sm:$0xff] }
 0x19d   : > { %5108 = vst [vmem:[#allocation40_spill] sm:$0xff] %v4241_v40  ;;  %v676_v39 = vmul.f32 %v3031_v28, %v4229_v35  ;;  %v5112_v47 = vrot.slane %v4021_v19, 1  ;;  %v2347_v46 = vrot.slane %v2226_v24, 2  ;;  %v749_v55 = vmul.f32 %v3029_v23, %v4229_v35 }
 0x19e   : > { %v4250_v52 = vsel %vm1074_vm4, %v5110_v41, %v1747_v37  ;;  %v750_v63 = vmul.f32 %v3029_v23, %v630_v12  ;;  %v4263_v15 = vsel %vm829_vm3, %v2101_v49, %v2103_v43  ;;  %v5114_v37 = vrot.slane %v4024_v7, 2  ;;  %v1233_v41 = vld [vmem:[#allocation2 + $0x88] sm:$0x3]  ;;  %v5117_v43 = vld [vmem:[#allocation3_spill] sm:$0xff] }
 0x19f   : > { %5111 = vst [vmem:[#allocation47_spill] sm:$0xff] %v4250_v52  ;;  %v4257_v48 = vsel %vm829_vm3, %v5112_v47, %v2101_v49  ;;  %5113 = vst [vmem:[#allocation42_spill] sm:$0xff] %v4263_v15  ;;  %v708_v1 = vadd.f32 %v3801_v50, %v676_v39  ;;  %v994_v19 = vmul.f32 %v3033_v29, %v4229_v35  ;;  %v856_v47 = vrot.slane %v749_v55, 1 }
 0x1a0   : > { %v4268_v10 = vsel %vm1074_vm4, %v5114_v37, %v2345_v53  ;;  %v4274_v24 = vsel %vm1074_vm4, %v2345_v53, %v2347_v46  ;;  %v858_v52 = vrot.slane %v750_v63, 1  ;;  %v995_v54 = vmul.f32 %v3033_v29, %v630_v12 }
 0x1a1   : > { %5115 = vst [vmem:[#allocation50_spill] sm:$0xff] %v4268_v10  ;;  %5116 = vst [vmem:[#allocation56_spill] sm:$0xff] %v4274_v24  ;;  %v1101_v49 = vrot.slane %v994_v19, 2  ;;  %v1196_v7 = vadd.f32 %v5118_v25, %v5117_v43  ;;  %v1280_v37 = vmul.f32 %v3059_v0, %v4229_v35  ;;  %v1352_v39 = vmul.f32 %v3064_v3, %v4229_v35 }
 0x1a2   : > { %v5119_v40 = vrot.slane %v4032_v59, 1  ;;  %v859_v53 = vsel %vm829_vm3, %v856_v47, %v858_v52  ;;  %v1103_v46 = vrot.slane %v995_v54, 2  ;;  %v1353_v55 = vmul.f32 %v3064_v3, %v1233_v41  ;;  %v5121_v59 = vld [vmem:[#allocation43_spill] sm:$0xff] }
 0x1a3   : > { %v953_v63 = vadd.f32 %v859_v53, %v708_v1  ;;  %v5120_v25 = vrot.slane %v4039_v62, 2  ;;  %v1312_v43 = vadd.f32 %v1280_v37, %v1196_v7  ;;  %v1456_v10 = vrot.slane %v1352_v39, 1  ;;  %v4307_v37 = vld [vmem:[#allocation2 + $0x140] sm:$0xff] }
 0x1a4   : > { %v857_v36 = vsel %vm829_vm3, %v5119_v40, %v856_v47  ;;  %v1104_v24 = vsel %vm1074_vm4, %v1101_v49, %v1103_v46  ;;  %v1458_v15 = vrot.slane %v1353_v55, 1  ;;  %v1554_v40 = vadd.f32 %v5121_v59, %v3844_v34 }
 0x1a5   : > { %v952_v12 = vadd.f32 %v857_v36, %v4042_v60  ;;  %v1102_v19 = vsel %vm1074_vm4, %v5120_v25, %v1101_v49  ;;  %v1198_v54 = vadd.f32 %v1104_v24, %v953_v63  ;;  %v1596_v52 = vmul.f32 %v3066_v4, %v4229_v35  ;;  %v1835_v60 = vld [vmem:[#allocation2 + $0x88] sm:$0x3]  ;;  %v5123_v49 = vld [vmem:[#allocation44_spill] sm:$0xff] }
 0x1a6   : > { %v1597_v36 = vmul.f32 %v3066_v4, %v1233_v41  ;;  %v5122_v62 = vrot.slane %v4055_v16, 1  ;;  %v1459_v47 = vsel %vm829_vm3, %v1456_v10, %v1458_v15  ;;  %v1798_v7 = vadd.f32 %v5123_v49, %v1554_v40 }
 0x1a7   : > { %v4295_v27 = vadd.f32 %v1102_v19, %v952_v12  ;;  %v1883_v34 = vmul.f32 %v3068_v5, %v4229_v35  ;;  %v4310_v24 = vadd.f32 %v4139_v13, %v1198_v54  ;;  %v1556_v41 = vadd.f32 %v1459_v47, %v1312_v43 }
 0x1a8   : > { %v1457_v1 = vsel %vm829_vm3, %v5122_v62, %v1456_v10  ;;  %v1700_v53 = vrot.slane %v1596_v52, 2  ;;  %v1702_v46 = vrot.slane %v1597_v36, 2  ;;  %v1954_v55 = vmul.f32 %v3070_v6, %v4229_v35  ;;  %v654_v36 = vld [vmem:[#allocation2 + $0x148] sm:$0x3] }
 0x1a9   : > { %v1555_v39 = vadd.f32 %v1457_v1, %v4069_v32  ;;  %v1915_v16 = vadd.f32 %v1883_v34, %v1798_v7  ;;  %v1955_v15 = vmul.f32 %v3070_v6, %v1835_v60  ;;  %v5124_v10 = vrot.slane %v4058_v58, 2 }
 0x1aa   : > { %v2198_v63 = vmul.f32 %v3857_v22, %v4229_v35  ;;  %v2199_v13 = vmul.f32 %v3857_v22, %v1835_v60  ;;  %v692_v32 = vmul.f32 %v3031_v28, %v4307_v37  ;;  %v1703_v25 = vsel %vm1074_vm4, %v1700_v53, %v1702_v46 }
 0x1ab   : > { %v1701_v12 = vsel %vm1074_vm4, %v5124_v10, %v1700_v53  ;;  %v2056_v43 = vrot.slane %v1954_v55, 1  ;;  %v2058_v59 = vrot.slane %v1955_v15, 1  ;;  %v1800_v40 = vadd.f32 %v1703_v25, %v1556_v41 }
 0x1ac   : > { %v1799_v19 = vadd.f32 %v1701_v12, %v1555_v39  ;;  %v2300_v54 = vrot.slane %v2198_v63, 2  ;;  %v2302_v52 = vrot.slane %v2199_v13, 2  ;;  %v724_v58 = vadd.f32 %v3801_v50, %v692_v32 }
 0x1ad   : > { %v5125_v35 = vrot.slane %v4067_v51, 1  ;;  %v2059_v1 = vsel %vm829_vm3, %v2056_v43, %v2058_v59  ;;  %v773_v47 = vmul.f32 %v3029_v23, %v4307_v37  ;;  %v1917_v49 = vadd.f32 %v4162_v57, %v1800_v40 }
 0x1ae   : > { %v1916_v62 = vadd.f32 %v3979_v31, %v1799_v19  ;;  %v2159_v34 = vadd.f32 %v2059_v1, %v1915_v16  ;;  %v5126_v39 = vrot.slane %v4074_v38, 2  ;;  %v2303_v51 = vsel %vm1074_vm4, %v2300_v54, %v2302_v52  ;;  %v1257_v1 = vld [vmem:[#allocation2 + $0x148] sm:$0x3] }
 0x1af   : > { %v2057_v60 = vsel %vm829_vm3, %v5125_v35, %v2056_v43  ;;  %v774_v53 = vmul.f32 %v3029_v23, %v654_v36  ;;  %v896_v46 = vrot.slane %v773_v47, 1  ;;  %v2161_v55 = vadd.f32 %v4195_v18, %v1917_v49  ;;  %v5129_v35 = vld [vmem:[#allocation48_spill] sm:$0xff] }
 0x1b0   : > { %v2158_v7 = vadd.f32 %v2057_v60, %v4098_v33  ;;  %v2301_v41 = vsel %vm1074_vm4, %v5126_v39, %v2300_v54  ;;  %v2160_v31 = vadd.f32 %v4188_v21, %v1916_v62  ;;  %v2403_v10 = vadd.f32 %v2303_v51, %v2159_v34 }
 0x1b1   : > { %v1018_v57 = vmul.f32 %v3033_v29, %v4307_v37  ;;  %v5127_v38 = vrot.slane %v4080_v11, 1  ;;  %v898_v12 = vrot.slane %v774_v53, 1  ;;  %v1019_v21 = vmul.f32 %v3033_v29, %v654_v36  ;;  %v5131_v53 = vld [vmem:[#allocation51_spill] sm:$0xff] }
 0x1b2   : > { %v2402_v15 = vadd.f32 %v2301_v41, %v2158_v7  ;;  %v2404_v33 = vadd.f32 %v4200_v26, %v2160_v31  ;;  %v2405_v63 = vadd.f32 %v4203_v14, %v2161_v55  ;;  %v2435_v32 = vmul.f32 0.2, %v2403_v10 }
 0x1b3   : > { %v897_v16 = vsel %vm829_vm3, %v5127_v38, %v896_v46  ;;  %v899_v19 = vsel %vm829_vm3, %v896_v46, %v898_v12  ;;  %v1141_v43 = vrot.slane %v1018_v57, 2  ;;  %v1143_v59 = vrot.slane %v1019_v21, 2  ;;  %v5132_v21 = vld [vmem:[#allocation52_spill] sm:$0xff] }
 0x1b4   : > { %v2434_v13 = vmul.f32 0.2, %v2402_v15  ;;  %v968_v18 = vadd.f32 %v897_v16, %v4089_v9  ;;  %v2436_v25 = vmul.f32 0.2, %v2404_v33  ;;  %v2437_v40 = vmul.f32 0.2, %v2405_v63 }
 0x1b5   : > { %v2467_v54 = vmax.f32 %v2403_v10, %v2435_v32  ;;  %v969_v11 = vadd.f32 %v899_v19, %v724_v58  ;;  %v5128_v36 = vrot.slane %v4086_v20, 2  ;;  %v1144_v62 = vsel %vm1074_vm4, %v1141_v43, %v1143_v59  ;;  %v5130_v9 = vld [vmem:[#allocation49_spill] sm:$0xff] }
 0x1b6   : > { %v2466_v26 = vmax.f32 %v2402_v15, %v2434_v13  ;;  %v2468_v52 = vmax.f32 %v2404_v33, %v2436_v25  ;;  %v1212_v60 = vadd.f32 %v5130_v9, %v5129_v35  ;;  %v2469_v47 = vmax.f32 %v2405_v63, %v2437_v40  ;;  %v1859_v15 = vld [vmem:[#allocation2 + $0x148] sm:$0x3]  ;;  %v637_v19 = vld [vmem:[#allocation2 + $0xc0] sm:$0xff] }
 0x1b7   : > { %v1142_v14 = vsel %vm1074_vm4, %v5128_v36, %v1141_v43  ;;  %v2795_v7 = vpack.c.bf16 %v2467_v54, %v2467_v54  ;;  %v1214_v58 = vadd.f32 %v1144_v62, %v969_v11  ;;  %v1296_v20 = vmul.f32 %v3059_v0, %v4307_v37 }
 0x1b8   : > { %v2794_v49 = vpack.c.bf16 %v2466_v26, %v2466_v26  ;;  %v4358_v34 = vadd.f32 %v1142_v14, %v968_v18  ;;  %v2796_v39 = vpack.c.bf16 %v2468_v52, %v2468_v52  ;;  %v1376_v41 = vmul.f32 %v3064_v3, %v4307_v37 }
 0x1b9   : > { %v2797_v31 = vpack.c.bf16 %v2469_v47, %v2469_v47  ;;  %2628 = vst.msk [vmem:[%s3466_s5 + $0x1c] sm:$0xf] %vm2620_vm5, %v2795_v7  ;;  %v1377_v51 = vmul.f32 %v3064_v3, %v1257_v1  ;;  %v1570_v46 = vadd.f32 %v5131_v53, %v3917_v42  ;;  %v1620_v55 = vmul.f32 %v3066_v4, %v4307_v37 }
 0x1ba   : > { %2627 = vst.msk [vmem:[%s3466_s5 + $0x18] sm:$0xf] %vm2620_vm5, %v2794_v49  ;;  %2629 = vst.msk [vmem:[%s3466_s5 + $0x20] sm:$0xf] %vm2620_vm5, %v2796_v39  ;;  %v1328_v10 = vadd.f32 %v1296_v20, %v1212_v60  ;;  %v4376_v57 = vadd.f32 %v4213_v44, %v1214_v58  ;;  %v1496_v33 = vrot.slane %v1376_v41, 1  ;;  %v1621_v38 = vmul.f32 %v3066_v4, %v1257_v1 }
 0x1bb   : > { %2630 = vst.msk [vmem:[%s3466_s5 + $0x24] sm:$0xf] %vm2620_vm5, %v2797_v31  ;;  %v1498_v16 = vrot.slane %v1377_v51, 1  ;;  %v1740_v12 = vrot.slane %v1620_v55, 2  ;;  %v1814_v63 = vadd.f32 %v5132_v21, %v1570_v46  ;;  %v1899_v42 = vmul.f32 %v3068_v5, %v4307_v37  ;;  %v5136_v51 = vld [vmem:[#allocation53_spill] sm:$0xff]  ;;  %v5138_v55 = vld [vmem:[#allocation42_spill] sm:$0xff] }
 0x1bc   : > { %v5133_v13 = vrot.slane %v4104_v45, 1  ;;  %v1742_v18 = vrot.slane %v1621_v38, 2  ;;  %v1978_v44 = vmul.f32 %v3070_v6, %v4307_v37  ;;  %v1979_v25 = vmul.f32 %v3070_v6, %v1859_v15  ;;  %v1264_v21 = vld [vmem:[#allocation2 + $0x180] sm:$0xff] }
 0x1bd   : > { %v1499_v43 = vsel %vm829_vm3, %v1496_v33, %v1498_v16  ;;  %v5134_v40 = vrot.slane %v4107_v61, 2  ;;  %v1931_v54 = vadd.f32 %v1899_v42, %v1814_v63  ;;  %v2222_v62 = vmul.f32 %v3857_v22, %v4307_v37  ;;  %v5140_v63 = vld [vmem:[#allocation56_spill] sm:$0xff] }
 0x1be   : > { %v1497_v32 = vsel %vm829_vm3, %v5133_v13, %v1496_v33  ;;  %v1572_v11 = vadd.f32 %v1499_v43, %v1328_v10  ;;  %v1743_v45 = vsel %vm1074_vm4, %v1740_v12, %v1742_v18  ;;  %v2096_v52 = vrot.slane %v1978_v44, 1 }
 0x1bf   : > { %v1571_v59 = vadd.f32 %v1497_v32, %v4115_v17  ;;  %v1741_v26 = vsel %vm1074_vm4, %v5134_v40, %v1740_v12  ;;  %v2098_v36 = vrot.slane %v1979_v25, 1  ;;  %v2223_v35 = vmul.f32 %v3857_v22, %v1859_v15 }
 0x1c0   : > { %v681_v9 = vmul.f32 %v3031_v28, %v637_v19  ;;  %v1816_v60 = vadd.f32 %v1743_v45, %v1572_v11  ;;  %v5135_v17 = vrot.slane %v4119_v56, 1  ;;  %v4405_v47 = vmul.f32 %v3029_v23, %v637_v19 }
 0x1c1   : > { %v1815_v14 = vadd.f32 %v1741_v26, %v1571_v59  ;;  %v2099_v1 = vsel %vm829_vm3, %v2096_v52, %v2098_v36  ;;  %v2340_v37 = vrot.slane %v2222_v62, 2  ;;  %v2342_v20 = vrot.slane %v2223_v35, 2 }
 0x1c2   : > { %v2097_v61 = vsel %vm829_vm3, %v5135_v17, %v2096_v52  ;;  %v2175_v39 = vadd.f32 %v2099_v1, %v1931_v54  ;;  %v1933_v58 = vadd.f32 %v4225_v2, %v1816_v60  ;;  %v4411_v41 = vadd.f32 %v3801_v50, %v681_v9  ;;  %v634_v60 = vld [vmem:[#allocation2 + $0xa8] sm:$0xff]  ;;  %v5166_v1 = vld [vmem:[#allocation20_spill] sm:$0xff] }
 0x1c3   : > { %v1932_v49 = vadd.f32 %v4018_v30, %v1815_v14  ;;  %v2174_v7 = vadd.f32 %v2097_v61, %v4136_v8  ;;  %v870_v56 = vrot.slane %v4405_v47, 1  ;;  %v5137_v53 = vrot.slane %v5136_v51, 2  ;;  %v5143_v51 = vld [vmem:[#allocation10_spill] sm:$0xff] }
 0x1c4   : > { %v4419_v30 = vmul.f32 %v3033_v29, %v637_v19  ;;  %v4422_v8 = vmul.f32 %v3059_v0, %v637_v19  ;;  %v2177_v2 = vadd.f32 %v5138_v55, %v1933_v58  ;;  %v2343_v15 = vsel %vm1074_vm4, %v2340_v37, %v2342_v20 }
 0x1c5   : > { %v2176_v31 = vadd.f32 %v4257_v48, %v1932_v49  ;;  %v2341_v46 = vsel %vm1074_vm4, %v5137_v53, %v2340_v37  ;;  %v4427_v10 = vmul.f32 %v3064_v3, %v637_v19  ;;  %v2419_v33 = vadd.f32 %v2343_v15, %v2175_v39  ;;  %v5139_v48 = vld [vmem:[#allocation50_spill] sm:$0xff]  ;;  %v5144_v53 = vld [vmem:[#allocation55_spill] sm:$0xff] }
 0x1c6   : > { %v2418_v50 = vadd.f32 %v2341_v46, %v2174_v7  ;;  %v4432_v12 = vmul.f32 %v3066_v4, %v637_v19  ;;  %v2421_v42 = vadd.f32 %v5140_v63, %v2177_v2  ;;  %v4437_v18 = vmul.f32 %v3068_v5, %v637_v19  ;;  %v5145_v15 = vld [vmem:[#allocation54_spill] sm:$0xff]  ;;  %v4496_v63 = vld [vmem:[%s4899_s3] ss:$0 sm:$0xff] }
 0x1c7   : > { %v2420_v38 = vadd.f32 %v5139_v48, %v2176_v31  ;;  %v2451_v44 = vmul.f32 0.2, %v2419_v33  ;;  %v4441_v59 = vmul.f32 %v3070_v6, %v637_v19  ;;  %v4444_v54 = vmul.f32 %v3857_v22, %v637_v19 }
 0x1c8   : > { %v2450_v13 = vmul.f32 0.2, %v2418_v50  ;;  %v2453_v40 = vmul.f32 0.2, %v2421_v42  ;;  %v4447_v11 = vmul.f32 %v3059_v0, %v1264_v21  ;;  %v4451_v14 = vmul.f32 %v3064_v3, %v1264_v21 }
 0x1c9   : > { %v2452_v25 = vmul.f32 0.2, %v2420_v38  ;;  %v2483_v45 = vmax.f32 %v2419_v33, %v2451_v44  ;;  %v4455_v19 = vmul.f32 %v3066_v4, %v1264_v21  ;;  %v4459_v49 = vmul.f32 %v3068_v5, %v1264_v21  ;;  %v5147_v33 = vld [vmem:[#allocation11_spill] sm:$0xff] }
 0x1ca   : > { %v2482_v26 = vmax.f32 %v2418_v50, %v2450_v13  ;;  %5141 = vst [vmem:[#allocation3_spill] sm:$0xff] %v4447_v11  ;;  %v2485_v62 = vmax.f32 %v2421_v42, %v2453_v40  ;;  %v4465_v37 = vmul.f32 %v3070_v6, %v1264_v21  ;;  %v4468_v58 = vmul.f32 %v3857_v22, %v1264_v21  ;;  %v658_v40 = vld [vmem:[#allocation2 + $0x168] sm:$0xff] }
 0x1cb   : > { %v2484_v52 = vmax.f32 %v2420_v38, %v2452_v25  ;;  %v2811_v17 = vpack.c.bf16 %v2483_v45, %v2483_v45  ;;  %5142 = vst [vmem:[#allocation4_spill] sm:$0xff] %v4459_v49  ;;  %v679_v20 = vmul.f32 %v3031_v28, %v634_v60  ;;  %v4476_v31 = vmul.f32 %v3029_v23, %v634_v60 }
 0x1cc   : > { %v2810_v35 = vpack.c.bf16 %v2482_v26, %v2482_v26  ;;  %v2813_v7 = vpack.c.bf16 %v2485_v62, %v2485_v62  ;;  %v954_v46 = vadd.f32 %v5144_v53, %v5143_v51  ;;  %v4481_v55 = vmul.f32 %v3033_v29, %v634_v60  ;;  %v5149_v26 = vld [vmem:[#allocation12_spill] sm:$0xff] }
 0x1cd   : > { %v2812_v61 = vpack.c.bf16 %v2484_v52, %v2484_v52  ;;  %2644 = vst.msk [vmem:[%s3466_s5 + $0x5c] sm:$0xf] %vm2620_vm5, %v2811_v17  ;;  %v5146_v50 = vrot.slane %v5145_v15, 2  ;;  %v5148_v48 = vrot.slane %v5147_v33, 2  ;;  %v1283_v21 = vmul.f32 %v3059_v0, %v634_v60  ;;  %v5154_v33 = vld [vmem:[#allocation36_spill] sm:$0xff] }
 0x1ce   : > { %2643 = vst.msk [vmem:[%s3466_s5 + $0x58] sm:$0xf] %vm2620_vm5, %v2810_v35  ;;  %2646 = vst.msk [vmem:[%s3466_s5 + $0x64] sm:$0xf] %vm2620_vm5, %v2813_v7  ;;  %v4499_v42 = vadd.f32 %v4496_v63, %v679_v20  ;;  %v1313_v45 = vadd.f32 %v5149_v26, %v4295_v27  ;;  %v4506_v52 = vmul.f32 %v3064_v3, %v634_v60  ;;  %v5150_v35 = vld [vmem:[#allocation35_spill] sm:$0xff] }
 0x1cf   : > { %2645 = vst.msk [vmem:[%s3466_s5 + $0x60] sm:$0xf] %vm2620_vm5, %v2812_v61  ;;  %v1107_v38 = vsel %vm1074_vm4, %v5148_v48, %v5146_v50  ;;  %v4509_v62 = vmul.f32 %v3066_v4, %v634_v60  ;;  %v5151_v17 = vrot.slane %v5150_v35, 2  ;;  %v5152_v61 = vld [vmem:[#allocation13_spill] sm:$0xff]  ;;  %v1886_v53 = vmul.f32 %v3068_v5, %v634_v60  ;;  %v4525_v27 = vld [vmem:[%s4898_s2 + $0x8] ss:$0 sm:$0xff] }
 0x1d0   : > { %v1199_v25 = vadd.f32 %v1107_v38, %v954_v46  ;;  %v5153_v7 = vrot.slane %v5152_v61, 2  ;;  %v4520_v46 = vmul.f32 %v3070_v6, %v634_v60  ;;  %v4528_v15 = vmul.f32 %v4525_v27, %v634_v60  ;;  %v5156_v61 = vld [vmem:[#allocation6_spill] sm:$0xff]  ;;  %v5164_v26 = vld [vmem:[#allocation39_spill] sm:$0xff] }
 0x1d1   : > { %v1557_v48 = vadd.f32 %v5154_v33, %v1313_v45  ;;  %v4537_v35 = vmul.f32 %v3029_v23, %v658_v40  ;;  %v4545_v45 = vmul.f32 %v3033_v29, %v658_v40  ;;  %v5157_v33 = vld [vmem:[#allocation38_spill] sm:$0xff]  ;;  %v1299_v22 = vmul.f32 %v3059_v0, %v658_v40 }
 0x1d2   : > { %v1706_v20 = vsel %vm1074_vm4, %v5153_v7, %v5151_v17  ;;  %v4516_v51 = vadd.f32 %v1283_v21, %v1199_v25  ;;  %v695_v21 = vmul.f32 %v3031_v28, %v658_v40  ;;  %v5155_v17 = vld [vmem:[#allocation16_spill] sm:$0xff]  ;;  %v5158_v38 = vrot.slane %v5157_v33, 2  ;;  %v5159_v50 = vld [vmem:[#allocation18_spill] sm:$0xff] }
 0x1d3   : > { %v970_v7 = vadd.f32 %v5156_v61, %v5155_v17  ;;  %v1801_v60 = vadd.f32 %v1706_v20, %v1557_v48  ;;  %v5160_v13 = vrot.slane %v5159_v50, 2  ;;  %v5161_v17 = vld [vmem:[#allocation19_spill] sm:$0xff]  ;;  %v4560_v61 = vmul.f32 %v3064_v3, %v658_v40  ;;  %v638_v50 = vld [vmem:[#allocation2 + $0xc8] sm:$0xff] }
 0x1d4   : > { %v4542_v44 = vadd.f32 %v4496_v63, %v695_v21  ;;  %v1329_v20 = vadd.f32 %v5161_v17, %v4358_v34  ;;  %v4563_v33 = vmul.f32 %v3066_v4, %v658_v40  ;;  %v5165_v39 = vrot.slane %v5164_v26, 2  ;;  %v1242_v17 = vld [vmem:[#allocation2 + $0xd0] sm:$0x3] }
 0x1d5   : > { %v1147_v25 = vsel %vm1074_vm4, %v5160_v13, %v5158_v38  ;;  %v4556_v48 = vadd.f32 %v1886_v53, %v1801_v60  ;;  %v639_v13 = vld [vmem:[#allocation2 + $0xd0] sm:$0x3]  ;;  %v5167_v34 = vrot.slane %v5166_v1, 2  ;;  %v1902_v60 = vmul.f32 %v3068_v5, %v658_v40 }
 0x1d6   : > { %v1215_v2 = vadd.f32 %v1147_v25, %v970_v7  ;;  %5162 = vst [vmem:[#allocation43_spill] sm:$0xff] %v4563_v33  ;;  %v5163_v25 = vld [vmem:[#allocation40_spill] sm:$0xff]  ;;  %v4577_v9 = vmul.f32 %v3070_v6, %v658_v40  ;;  %v758_v26 = vmul.f32 %v3029_v23, %v638_v50  ;;  %v759_v1 = vmul.f32 %v3029_v23, %v639_v13  ;;  %v5181_v33 = vld [vmem:[#allocation30_spill] sm:$0xff] }
 0x1d7   : > { %v1573_v7 = vadd.f32 %v5163_v25, %v1329_v20  ;;  %v1746_v53 = vsel %vm1074_vm4, %v5167_v34, %v5165_v39  ;;  %v682_v20 = vmul.f32 %v3031_v28, %v638_v50  ;;  %v1003_v34 = vmul.f32 %v3033_v29, %v638_v50 }
 0x1d8   : > { %v4565_v38 = vadd.f32 %v1299_v22, %v1215_v2  ;;  %5168 = vst [vmem:[#allocation44_spill] sm:$0xff] %v4577_v9  ;;  %v4580_v22 = vmul.f32 %v4525_v27, %v658_v40  ;;  %v1004_v21 = vmul.f32 %v3033_v29, %v639_v13  ;;  %v4593_v16 = vmul.f32 %v3059_v0, %v638_v50  ;;  %v1844_v9 = vld [vmem:[#allocation2 + $0xd0] sm:$0x3] }
 0x1d9   : > { %v1817_v2 = vadd.f32 %v1746_v53, %v1573_v7  ;;  %v714_v40 = vadd.f32 %v4496_v63, %v682_v20  ;;  %v871_v7 = vrot.slane %v758_v26, 1  ;;  %v873_v53 = vrot.slane %v759_v1, 1 }
 0x1da   : > { %5169 = vst [vmem:[#allocation48_spill] sm:$0xff] %v4580_v22  ;;  %v1116_v43 = vrot.slane %v1003_v34, 2  ;;  %v1118_v32 = vrot.slane %v1004_v21, 2  ;;  %v1361_v39 = vmul.f32 %v3064_v3, %v638_v50  ;;  %v5171_v21 = vrot.slane %v4419_v30, 2 }
 0x1db   : > { %v4589_v36 = vadd.f32 %v1902_v60, %v1817_v2  ;;  %v872_v25 = vsel %vm829_vm3, %v870_v56, %v871_v7  ;;  %v874_v13 = vsel %vm829_vm3, %v871_v7, %v873_v53  ;;  %v1362_v60 = vmul.f32 %v3064_v3, %v1242_v17 }
 0x1dc   : > { %v1605_v2 = vmul.f32 %v3066_v4, %v638_v50  ;;  %v958_v20 = vadd.f32 %v872_v25, %v4411_v41  ;;  %v959_v26 = vadd.f32 %v874_v13, %v714_v40  ;;  %v1117_v1 = vsel %vm1074_vm4, %v5171_v21, %v1116_v43  ;;  %v1265_v25 = vld [vmem:[#allocation2 + $0x188] sm:$0xff]  ;;  %v5174_v13 = vld [vmem:[#allocation8_spill] sm:$0xff] }
 0x1dd   : > { %5170 = vst [vmem:[#allocation49_spill] sm:$0xff] %v4589_v36  ;;  %v1119_v34 = vsel %vm1074_vm4, %v1116_v43, %v1118_v32  ;;  %v1471_v22 = vrot.slane %v1361_v39, 1  ;;  %v1473_v36 = vrot.slane %v1362_v60, 1  ;;  %v1606_v47 = vmul.f32 %v3066_v4, %v1242_v17 }
 0x1de   : > { %v1715_v56 = vrot.slane %v1605_v2, 2  ;;  %v1203_v7 = vadd.f32 %v1117_v1, %v958_v20  ;;  %v1204_v53 = vadd.f32 %v1119_v34, %v959_v26  ;;  %v4609_v49 = vmul.f32 %v3068_v5, %v638_v50  ;;  %v5175_v2 = vld [vmem:[#allocation25_spill] sm:$0xff]  ;;  %v5177_v34 = vld [vmem:[#allocation26_spill] sm:$0xff] }
 0x1df   : > { %v1963_v41 = vmul.f32 %v3070_v6, %v638_v50  ;;  %v5172_v30 = vrot.slane %v4427_v10, 1  ;;  %v4618_v32 = vsel %vm829_vm3, %v1471_v22, %v1473_v36  ;;  %v5173_v43 = vrot.slane %v4432_v12, 2  ;;  %v1266_v10 = vld [vmem:[#allocation2 + $0x190] sm:$0x3] }
 0x1e0   : > { %v1717_v39 = vrot.slane %v1606_v47, 2  ;;  %v1319_v60 = vadd.f32 %v5174_v13, %v1203_v7  ;;  %v1320_v20 = vadd.f32 %v5175_v2, %v1204_v53  ;;  %v1964_v26 = vmul.f32 %v3070_v6, %v1844_v9 }
 0x1e1   : > { %v4615_v40 = vsel %vm829_vm3, %v5172_v30, %v1471_v22  ;;  %v4623_v17 = vsel %vm1074_vm4, %v5173_v43, %v1715_v56  ;;  %v2071_v21 = vrot.slane %v1963_v41, 1  ;;  %v2207_v36 = vmul.f32 %v4525_v27, %v638_v50  ;;  %v5178_v30 = vld [vmem:[#allocation28_spill] sm:$0xff] }
 0x1e2   : > { %v4629_v1 = vsel %vm1074_vm4, %v1715_v56, %v1717_v39  ;;  %v2208_v22 = vmul.f32 %v4525_v27, %v1844_v9  ;;  %v4634_v12 = vmul.f32 %v3059_v0, %v1265_v25  ;;  %v1563_v47 = vadd.f32 %v5177_v34, %v1319_v60  ;;  %v5180_v9 = vld [vmem:[#allocation29_spill] sm:$0xff] }
 0x1e3   : > { %v1564_v7 = vadd.f32 %v5178_v30, %v1320_v20  ;;  %v5179_v53 = vrot.slane %v4441_v59, 1  ;;  %v2073_v41 = vrot.slane %v1964_v26, 1  ;;  %v2315_v13 = vrot.slane %v2207_v36, 2  ;;  %v5183_v30 = vld [vmem:[#allocation7_spill] sm:$0xff] }
 0x1e4   : > { %5176 = vst [vmem:[#allocation51_spill] sm:$0xff] %v4634_v12  ;;  %v2317_v56 = vrot.slane %v2208_v22, 2  ;;  %v1385_v39 = vmul.f32 %v3064_v3, %v1265_v25  ;;  %v1386_v50 = vmul.f32 %v3064_v3, %v1266_v10  ;;  %v1807_v2 = vadd.f32 %v5180_v9, %v1563_v47  ;;  %v5184_v47 = vld [vmem:[#allocation17_spill] sm:$0xff] }
 0x1e5   : > { %v4641_v43 = vsel %vm829_vm3, %v5179_v53, %v2071_v21  ;;  %v1808_v12 = vadd.f32 %v5181_v33, %v1564_v7  ;;  %v4648_v60 = vsel %vm829_vm3, %v2071_v21, %v2073_v41  ;;  %v1629_v20 = vmul.f32 %v3066_v4, %v1265_v25  ;;  %v1868_v7 = vld [vmem:[#allocation2 + $0x190] sm:$0x3] }
 0x1e6   : > { %v5182_v59 = vrot.slane %v4444_v54, 2  ;;  %v4657_v26 = vsel %vm1074_vm4, %v2315_v13, %v2317_v56  ;;  %v1511_v36 = vrot.slane %v1385_v39, 1  ;;  %v1513_v22 = vrot.slane %v1386_v50, 1  ;;  %v4674_v39 = vld [vmem:[#allocation2 + $0xb0] sm:$0xff] }
 0x1e7   : > { %v1924_v53 = vadd.f32 %v5183_v30, %v1807_v2  ;;  %v1925_v9 = vadd.f32 %v5184_v47, %v1808_v12  ;;  %v1630_v33 = vmul.f32 %v3066_v4, %v1266_v10  ;;  %v1755_v21 = vrot.slane %v1629_v20, 2  ;;  %v5189_v12 = vld [vmem:[#allocation21_spill] sm:$0xff]  ;;  %v5190_v10 = vld [vmem:[#allocation22_spill] sm:$0xff] }
 0x1e8   : > { %v4654_v34 = vsel %vm1074_vm4, %v5182_v59, %v2315_v13  ;;  %v5185_v41 = vrot.slane %v4451_v14, 1  ;;  %v4668_v59 = vsel %vm829_vm3, %v1511_v36, %v1513_v22  ;;  %v4671_v13 = vmul.f32 %v3068_v5, %v1265_v25 }
 0x1e9   : > { %5187 = vst [vmem:[#allocation53_spill] sm:$0xff] %v4668_v59  ;;  %v1987_v56 = vmul.f32 %v3070_v6, %v1265_v25  ;;  %v2168_v50 = vadd.f32 %v5189_v12, %v1924_v53  ;;  %v2169_v2 = vadd.f32 %v5190_v10, %v1925_v9  ;;  %v5191_v20 = vrot.slane %v4455_v19, 2  ;;  %v636_v9 = vld [vmem:[#allocation2 + $0xb8] sm:$0x3] }
 0x1ea   : > { %v4665_v54 = vsel %vm829_vm3, %v5185_v41, %v1511_v36  ;;  %5188 = vst [vmem:[#allocation42_spill] sm:$0xff] %v4671_v13  ;;  %v1757_v30 = vrot.slane %v1630_v33, 2  ;;  %v1988_v36 = vmul.f32 %v3070_v6, %v1868_v7  ;;  %v2231_v47 = vmul.f32 %v4525_v27, %v1265_v25  ;;  %v5192_v13 = vld [vmem:[#allocation23_spill] sm:$0xff] }
 0x1eb   : > { %5186 = vst [vmem:[#allocation52_spill] sm:$0xff] %v4665_v54  ;;  %v4681_v14 = vsel %vm1074_vm4, %v5191_v20, %v1755_v21  ;;  %v2111_v22 = vrot.slane %v1987_v56, 1  ;;  %v2232_v41 = vmul.f32 %v4525_v27, %v1868_v7  ;;  %v2412_v59 = vadd.f32 %v5192_v13, %v2168_v50  ;;  %v5193_v54 = vld [vmem:[#allocation24_spill] sm:$0xff] }
 0x1ec   : > { %v2413_v11 = vadd.f32 %v5193_v54, %v2169_v2  ;;  %v4689_v53 = vsel %vm1074_vm4, %v1755_v21, %v1757_v30  ;;  %v680_v19 = vmul.f32 %v3031_v28, %v4674_v39  ;;  %v5194_v33 = vrot.slane %v4465_v37, 1 }
 0x1ed   : > { %v2113_v56 = vrot.slane %v1988_v36, 1  ;;  %v2355_v25 = vrot.slane %v2231_v47, 2  ;;  %v2357_v10 = vrot.slane %v2232_v41, 2  ;;  %v2444_v7 = vmul.f32 0.2, %v2412_v59 }
 0x1ee   : > { %v4696_v12 = vsel %vm829_vm3, %v5194_v33, %v2111_v22  ;;  %v2445_v20 = vmul.f32 0.2, %v2413_v11  ;;  %v712_v13 = vadd.f32 %v4496_v63, %v680_v19  ;;  %v755_v21 = vmul.f32 %v3029_v23, %v4674_v39 }
 0x1ef   : > { %v4702_v54 = vsel %vm829_vm3, %v2111_v22, %v2113_v56  ;;  %v5195_v50 = vrot.slane %v4468_v58, 2  ;;  %v4710_v2 = vsel %vm1074_vm4, %v2355_v25, %v2357_v10  ;;  %v756_v30 = vmul.f32 %v3029_v23, %v636_v9  ;;  %v5198_v58 = vld [vmem:[#allocation15_spill] sm:$0xff]  ;;  %v5199_v56 = vld [vmem:[#allocation5_spill] sm:$0xff] }
 0x1f0   : > { %5197 = vst [vmem:[#allocation56_spill] sm:$0xff] %v4710_v2  ;;  %v2476_v36 = vmax.f32 %v2412_v59, %v2444_v7  ;;  %v2477_v47 = vmax.f32 %v2413_v11, %v2445_v20  ;;  %v866_v41 = vrot.slane %v755_v21, 1  ;;  %v1000_v19 = vmul.f32 %v3033_v29, %v4674_v39 }
 0x1f1   : > { %v4707_v37 = vsel %vm1074_vm4, %v5195_v50, %v2355_v25  ;;  %v868_v22 = vrot.slane %v756_v30, 1  ;;  %v1001_v33 = vmul.f32 %v3033_v29, %v636_v9  ;;  %v1200_v50 = vadd.f32 %v5199_v56, %v5198_v58 }
 0x1f2   : > { %5196 = vst [vmem:[#allocation50_spill] sm:$0xff] %v4707_v37  ;;  %v1239_v37 = vld [vmem:[#allocation2 + $0xb8] sm:$0x3]  ;;  %v1284_v25 = vmul.f32 %v3059_v0, %v4674_v39  ;;  %v2804_v10 = vpack.c.bf16 %v2476_v36, %v2476_v36  ;;  %v2805_v2 = vpack.c.bf16 %v2477_v47, %v2477_v47  ;;  %v5200_v11 = vrot.slane %v4476_v31, 1 }
 0x1f3   : > { %v1111_v7 = vrot.slane %v1000_v19, 2  ;;  %v869_v20 = vsel %vm829_vm3, %v866_v41, %v868_v22  ;;  %v1113_v30 = vrot.slane %v1001_v33, 2  ;;  %v5201_v56 = vrot.slane %v4481_v55, 2 }
 0x1f4   : > { %v867_v59 = vsel %vm829_vm3, %v5200_v11, %v866_v41  ;;  %v1316_v9 = vadd.f32 %v1284_v25, %v1200_v50  ;;  %2637 = vst.msk [vmem:[%s3466_s5 + $0x40] sm:$0xf] %vm2620_vm5, %v2804_v10  ;;  %2638 = vst.msk [vmem:[%s3466_s5 + $0x44] sm:$0xf] %vm2620_vm5, %v2805_v2  ;;  %v957_v58 = vadd.f32 %v869_v20, %v712_v13  ;;  %v5203_v11 = vld [vmem:[#allocation14_spill] sm:$0xff] }
 0x1f5   : > { %v956_v21 = vadd.f32 %v867_v59, %v4499_v42  ;;  %v1112_v36 = vsel %vm1074_vm4, %v5201_v56, %v1111_v7  ;;  %v1358_v31 = vmul.f32 %v3064_v3, %v4674_v39  ;;  %v1359_v47 = vmul.f32 %v3064_v3, %v1239_v37  ;;  %v5202_v42 = vld [vmem:[#allocation37_spill] sm:$0xff]  ;;  %v1841_v56 = vld [vmem:[#allocation2 + $0xb8] sm:$0x3] }
 0x1f6   : > { %v1114_v41 = vsel %vm1074_vm4, %v1111_v7, %v1113_v30  ;;  %v1558_v22 = vadd.f32 %v5202_v42, %v4310_v24  ;;  %v1602_v33 = vmul.f32 %v3066_v4, %v4674_v39  ;;  %v1603_v55 = vmul.f32 %v3066_v4, %v1239_v37 }
 0x1f7   : > { %v1201_v19 = vadd.f32 %v1112_v36, %v956_v21  ;;  %v1202_v2 = vadd.f32 %v1114_v41, %v957_v58  ;;  %v1466_v13 = vrot.slane %v1358_v31, 1  ;;  %v1468_v50 = vrot.slane %v1359_v47, 1 }
 0x1f8   : > { %v1710_v10 = vrot.slane %v1602_v33, 2  ;;  %v1802_v59 = vadd.f32 %v5203_v11, %v1558_v22  ;;  %v1887_v7 = vmul.f32 %v3068_v5, %v4674_v39  ;;  %v5204_v24 = vrot.slane %v4506_v52, 1 }
 0x1f9   : > { %v1317_v25 = vadd.f32 %v4422_v8, %v1201_v19  ;;  %v1318_v20 = vadd.f32 %v4593_v16, %v1202_v2  ;;  %v1469_v30 = vsel %vm829_vm3, %v1466_v13, %v1468_v50  ;;  %v1712_v58 = vrot.slane %v1603_v55, 2  ;;  %v5206_v50 = vld [vmem:[#allocation9_spill] sm:$0xff] }
 0x1fa   : > { %v1467_v21 = vsel %vm829_vm3, %v5204_v24, %v1466_v13  ;;  %v1560_v36 = vadd.f32 %v1469_v30, %v1316_v9  ;;  %v5205_v31 = vrot.slane %v4509_v62, 2  ;;  %v1919_v52 = vadd.f32 %v1887_v7, %v1802_v59  ;;  %v5209_v30 = vld [vmem:[#allocation31_spill] sm:$0xff] }
 0x1fb   : > { %v1559_v37 = vadd.f32 %v1467_v21, %v4516_v51  ;;  %v1561_v8 = vadd.f32 %v4615_v40, %v1317_v25  ;;  %v1562_v41 = vadd.f32 %v4618_v32, %v1318_v20  ;;  %v1713_v16 = vsel %vm1074_vm4, %v1710_v10, %v1712_v58 }
 0x1fc   : > { %v1711_v47 = vsel %vm1074_vm4, %v5205_v31, %v1710_v10  ;;  %v1960_v19 = vmul.f32 %v3070_v6, %v4674_v39  ;;  %v1804_v22 = vadd.f32 %v1713_v16, %v1560_v36  ;;  %v1961_v51 = vmul.f32 %v3070_v6, %v1841_v56  ;;  %v5207_v10 = vld [vmem:[#allocation27_spill] sm:$0xff]  ;;  %v5213_v16 = vld [vmem:[#allocation34_spill] sm:$0xff] }
 0x1fd   : > { %v1803_v42 = vadd.f32 %v1711_v47, %v1559_v37  ;;  %v1805_v33 = vadd.f32 %v4623_v17, %v1561_v8  ;;  %v1806_v40 = vadd.f32 %v4629_v1, %v1562_v41  ;;  %v2204_v62 = vmul.f32 %v4525_v27, %v4674_v39 }
 0x1fe   : > { %v2066_v9 = vrot.slane %v1960_v19, 1  ;;  %v2205_v32 = vmul.f32 %v4525_v27, %v1841_v56  ;;  %v1921_v13 = vadd.f32 %v4609_v49, %v1804_v22  ;;  %v2068_v25 = vrot.slane %v1961_v51, 1  ;;  %v4776_v49 = vld [vmem:[#allocation2 + $0x170] sm:$0xff]  ;;  %v5210_v56 = vld [vmem:[#allocation32_spill] sm:$0xff] }
 0x1ff   : > { %v1920_v2 = vadd.f32 %v4437_v18, %v1803_v42  ;;  %v1922_v55 = vadd.f32 %v5206_v50, %v1805_v33  ;;  %v1923_v11 = vadd.f32 %v5207_v10, %v1806_v40  ;;  %v5208_v17 = vrot.slane %v4520_v46, 1  ;;  %v660_v19 = vld [vmem:[#allocation2 + $0x178] sm:$0x3] }
 0x200   : > { %v2310_v1 = vrot.slane %v2204_v62, 2  ;;  %v2312_v7 = vrot.slane %v2205_v32, 2  ;;  %v2069_v20 = vsel %vm829_vm3, %v2066_v9, %v2068_v25  ;;  %v2165_v18 = vadd.f32 %v4648_v60, %v1921_v13  ;;  %v5212_v60 = vld [vmem:[#allocation33_spill] sm:$0xff] }
 0x201   : > { %v2067_v59 = vsel %vm829_vm3, %v5208_v17, %v2066_v9  ;;  %v2164_v24 = vadd.f32 %v4641_v43, %v1920_v2  ;;  %v2163_v21 = vadd.f32 %v2069_v20, %v1919_v52  ;;  %v2166_v58 = vadd.f32 %v5209_v30, %v1922_v55 }
 0x202   : > { %v2162_v39 = vadd.f32 %v2067_v59, %v4556_v48  ;;  %v2167_v37 = vadd.f32 %v5210_v56, %v1923_v11  ;;  %v5211_v46 = vrot.slane %v4528_v15, 2  ;;  %v2313_v8 = vsel %vm1074_vm4, %v2310_v1, %v2312_v7  ;;  %v5216_v56 = vld [vmem:[#allocation45_spill] sm:$0xff] }
 0x203   : > { %v2408_v48 = vadd.f32 %v4654_v34, %v2164_v24  ;;  %v2409_v43 = vadd.f32 %v4657_v26, %v2165_v18  ;;  %v2407_v47 = vadd.f32 %v2313_v8, %v2163_v21  ;;  %v2410_v41 = vadd.f32 %v5212_v60, %v2166_v58  ;;  %v5215_v58 = vld [vmem:[#allocation46_spill] sm:$0xff] }
 0x204   : > { %v2311_v36 = vsel %vm1074_vm4, %v5211_v46, %v2310_v1  ;;  %v2411_v52 = vadd.f32 %v5213_v16, %v2167_v37  ;;  %v696_v42 = vmul.f32 %v3031_v28, %v4776_v49  ;;  %v779_v51 = vmul.f32 %v3029_v23, %v4776_v49 }
 0x205   : > { %v2406_v31 = vadd.f32 %v2311_v36, %v2162_v39  ;;  %v2440_v15 = vmul.f32 0.2, %v2408_v48  ;;  %v2441_v33 = vmul.f32 0.2, %v2409_v43  ;;  %v2439_v40 = vmul.f32 0.2, %v2407_v47 }
 0x206   : > { %v2442_v9 = vmul.f32 0.2, %v2410_v41  ;;  %v2443_v34 = vmul.f32 0.2, %v2411_v52  ;;  %v728_v26 = vadd.f32 %v4496_v63, %v696_v42  ;;  %v780_v13 = vmul.f32 %v3029_v23, %v660_v19  ;;  %v1263_v23 = vld [vmem:[#allocation2 + $0x178] sm:$0x3] }
 0x207   : > { %v2438_v22 = vmul.f32 0.2, %v2406_v31  ;;  %v2472_v32 = vmax.f32 %v2408_v48, %v2440_v15  ;;  %v2473_v2 = vmax.f32 %v2409_v43, %v2441_v33  ;;  %v2471_v28 = vmax.f32 %v2407_v47, %v2439_v40  ;;  %v5219_v42 = vld [vmem:[#allocation47_spill] sm:$0xff]  ;;  %v1869_v40 = vld [vmem:[#allocation2 + $0x198] sm:$0xff] }
 0x208   : > { %v2474_v50 = vmax.f32 %v2410_v41, %v2442_v9  ;;  %v2475_v55 = vmax.f32 %v2411_v52, %v2443_v34  ;;  %v906_v25 = vrot.slane %v779_v51, 1  ;;  %v908_v59 = vrot.slane %v780_v13, 1  ;;  %v1870_v9 = vld [vmem:[#allocation2 + $0x1a0] sm:$0xff] }
 0x209   : > { %v2470_v62 = vmax.f32 %v2406_v31, %v2438_v22  ;;  %v2800_v11 = vpack.c.bf16 %v2472_v32, %v2472_v32  ;;  %v2801_v17 = vpack.c.bf16 %v2473_v2, %v2473_v2  ;;  %v2799_v63 = vpack.c.bf16 %v2471_v28, %v2471_v28  ;;  %v5217_v31 = vld [vmem:[#allocation41_spill] sm:$0xff]  ;;  %v5222_v2 = vld [vmem:[#allocation51_spill] sm:$0xff] }
 0x20a   : > { %v2802_v1 = vpack.c.bf16 %v2474_v50, %v2474_v50  ;;  %v2803_v7 = vpack.c.bf16 %v2475_v55, %v2475_v55  ;;  %v5214_v20 = vrot.slane %v4537_v35, 1  ;;  %v909_v24 = vsel %vm829_vm3, %v906_v25, %v908_v59  ;;  %v5223_v50 = vld [vmem:[#allocation43_spill] sm:$0xff]  ;;  %v5225_v59 = vld [vmem:[#allocation52_spill] sm:$0xff] }
 0x20b   : > { %v2798_v10 = vpack.c.bf16 %v2470_v62, %v2470_v62  ;;  %2633 = vst.msk [vmem:[%s3466_s5 + $0x30] sm:$0xf] %vm2620_vm5, %v2800_v11  ;;  %2634 = vst.msk [vmem:[%s3466_s5 + $0x34] sm:$0xf] %vm2620_vm5, %v2801_v17  ;;  %v1024_v21 = vmul.f32 %v3033_v29, %v4776_v49  ;;  %v1025_v30 = vmul.f32 %v3033_v29, %v660_v19  ;;  %v5218_v16 = vrot.slane %v4545_v45, 2  ;;  %v5221_v62 = vld [vmem:[#allocation3_spill] sm:$0xff] }
 0x20c   : > { %v907_v39 = vsel %vm829_vm3, %v5214_v20, %v906_v25  ;;  %2632 = vst.msk [vmem:[%s3466_s5 + $0x2c] sm:$0xf] %vm2620_vm5, %v2799_v63  ;;  %2635 = vst.msk [vmem:[%s3466_s5 + $0x38] sm:$0xf] %vm2620_vm5, %v2802_v1  ;;  %v973_v35 = vadd.f32 %v909_v24, %v728_v26  ;;  %v1216_v37 = vadd.f32 %v5216_v56, %v5215_v58  ;;  %v1865_v25 = vld [vmem:[#allocation2 + $0x178] sm:$0x3] }
 0x20d   : > { %2631 = vst.msk [vmem:[%s3466_s5 + $0x28] sm:$0xf] %vm2620_vm5, %v2798_v10  ;;  %v972_v18 = vadd.f32 %v907_v39, %v4542_v44  ;;  %2636 = vst.msk [vmem:[%s3466_s5 + $0x3c] sm:$0xf] %vm2620_vm5, %v2803_v7  ;;  %v1300_v46 = vmul.f32 %v3059_v0, %v4776_v49  ;;  %v1382_v44 = vmul.f32 %v3064_v3, %v4776_v49  ;;  %v1151_v36 = vrot.slane %v1024_v21, 2  ;;  %v5226_v1 = vld [vmem:[#allocation53_spill] sm:$0xff] }
 0x20e   : > { %v1153_v8 = vrot.slane %v1025_v30, 2  ;;  %v1383_v29 = vmul.f32 %v3064_v3, %v1263_v23  ;;  %v1574_v48 = vadd.f32 %v5217_v31, %v4376_v57  ;;  %v1626_v60 = vmul.f32 %v3066_v4, %v4776_v49  ;;  %v1871_v39 = vld [vmem:[#allocation2 + $0x1a8] sm:$0x3]  ;;  %v5227_v24 = vld [vmem:[#allocation4_spill] sm:$0xff] }
 0x20f   : > { %v1332_v43 = vadd.f32 %v1300_v46, %v1216_v37  ;;  %v1506_v47 = vrot.slane %v1382_v44, 1  ;;  %v1627_v41 = vmul.f32 %v3066_v4, %v1263_v23  ;;  %v1152_v0 = vsel %vm1074_vm4, %v5218_v16, %v1151_v36  ;;  %v5228_v56 = vld [vmem:[#allocation42_spill] sm:$0xff] }
 0x210   : > { %v1154_v52 = vsel %vm1074_vm4, %v1151_v36, %v1153_v8  ;;  %v1508_v19 = vrot.slane %v1383_v29, 1  ;;  %v1818_v22 = vadd.f32 %v5219_v42, %v1574_v48  ;;  %v1217_v3 = vadd.f32 %v1152_v0, %v972_v18 }
 0x211   : > { %v1218_v15 = vadd.f32 %v1154_v52, %v973_v35  ;;  %v5220_v57 = vrot.slane %v4560_v61, 1  ;;  %v1750_v51 = vrot.slane %v1626_v60, 2  ;;  %v1752_v34 = vrot.slane %v1627_v41, 2  ;;  %v5229_v60 = vld [vmem:[#allocation44_spill] sm:$0xff] }
 0x212   : > { %v1509_v4 = vsel %vm829_vm3, %v1506_v47, %v1508_v19  ;;  %v1903_v26 = vmul.f32 %v3068_v5, %v4776_v49  ;;  %v1333_v32 = vadd.f32 %v5221_v62, %v1217_v3  ;;  %v5224_v61 = vrot.slane %v5223_v50, 2 }
 0x213   : > { %v1507_v33 = vsel %vm829_vm3, %v5220_v57, %v1506_v47  ;;  %v1334_v13 = vadd.f32 %v5222_v2, %v1218_v15  ;;  %v1576_v28 = vadd.f32 %v1509_v4, %v1332_v43  ;;  %v1753_v10 = vsel %vm1074_vm4, %v1750_v51, %v1752_v34 }
 0x214   : > { %v1575_v45 = vadd.f32 %v1507_v33, %v4565_v38  ;;  %v1751_v55 = vsel %vm1074_vm4, %v5224_v61, %v1750_v51  ;;  %v1906_v17 = vmul.f32 %v3068_v5, %v1869_v40  ;;  %v1907_v38 = vmul.f32 %v3068_v5, %v1870_v9 }
 0x215   : > { %v1577_v63 = vadd.f32 %v5225_v59, %v1333_v32  ;;  %v1578_v7 = vadd.f32 %v5226_v1, %v1334_v13  ;;  %v1820_v20 = vadd.f32 %v1753_v10, %v1576_v28  ;;  %v1935_v23 = vadd.f32 %v1903_v26, %v1818_v22  ;;  %v5232_v26 = vld [vmem:[#allocation50_spill] sm:$0xff]  ;;  %v5233_v32 = vld [vmem:[#allocation56_spill] sm:$0xff] }
 0x216   : > { %v1819_v11 = vadd.f32 %v1751_v55, %v1575_v45  ;;  %v1984_v21 = vmul.f32 %v3070_v6, %v4776_v49  ;;  %v1985_v30 = vmul.f32 %v3070_v6, %v1865_v25  ;;  %v1989_v35 = vmul.f32 %v3070_v6, %v1869_v40 }
 0x217   : > { %v1821_v58 = vadd.f32 %v4681_v14, %v1577_v63  ;;  %v1822_v5 = vadd.f32 %v4689_v53, %v1578_v7  ;;  %v1937_v37 = vadd.f32 %v5228_v56, %v1820_v20  ;;  %v1990_v46 = vmul.f32 %v3070_v6, %v1870_v9 }
 0x218   : > { %v1936_v18 = vadd.f32 %v5227_v24, %v1819_v11  ;;  %v1991_v44 = vmul.f32 %v3070_v6, %v1871_v39  ;;  %v2106_v36 = vrot.slane %v1984_v21, 1  ;;  %v2108_v8 = vrot.slane %v1985_v30, 1  ;;  %v5231_v6 = vld [vmem:[#allocation49_spill] sm:$0xff] }
 0x219   : > { %v2115_v29 = vrot.slane %v1989_v35, 1  ;;  %v1938_v31 = vadd.f32 %v1906_v17, %v1821_v58  ;;  %v1939_v48 = vadd.f32 %v1907_v38, %v1822_v5  ;;  %v2116_v43 = vrot.slane %v1990_v46, 1 }
 0x21a   : > { %v2180_v47 = vadd.f32 %v4696_v12, %v1936_v18  ;;  %v5230_v41 = vrot.slane %v5229_v60, 1  ;;  %v2109_v53 = vsel %vm829_vm3, %v2106_v36, %v2108_v8  ;;  %v2118_v16 = vrot.slane %v1991_v44, 1 }
 0x21b   : > { %v2181_v0 = vadd.f32 %v4702_v54, %v1937_v37  ;;  %v2117_v52 = vsel %vm829_vm3, %v2115_v29, %v2116_v43  ;;  %v2179_v42 = vadd.f32 %v2109_v53, %v1935_v23  ;;  %v2228_v22 = vmul.f32 %v4525_v27, %v4776_v49  ;;  %v5234_v49 = vld [vmem:[#allocation48_spill] sm:$0xff] }
 0x21c   : > { %v2107_v14 = vsel %vm829_vm3, %v5230_v41, %v2106_v36  ;;  %v2119_v3 = vsel %vm829_vm3, %v2116_v43, %v2118_v16  ;;  %v2182_v12 = vadd.f32 %v2117_v52, %v1938_v31  ;;  %v2229_v15 = vmul.f32 %v4525_v27, %v1865_v25 }
 0x21d   : > { %v2178_v19 = vadd.f32 %v2107_v14, %v5231_v6  ;;  %v2233_v57 = vmul.f32 %v4525_v27, %v1869_v40  ;;  %v2183_v33 = vadd.f32 %v2119_v3, %v1939_v48  ;;  %v2234_v51 = vmul.f32 %v4525_v27, %v1870_v9 }
 0x21e   : > { %v2235_v54 = vmul.f32 %v4525_v27, %v1871_v39  ;;  %v2350_v4 = vrot.slane %v2228_v22, 2  ;;  %v2352_v45 = vrot.slane %v2229_v15, 2  ;;  %v2424_v62 = vadd.f32 %v5232_v26, %v2180_v47 }
 0x21f   : > { %v2359_v34 = vrot.slane %v2233_v57, 2  ;;  %v2425_v2 = vadd.f32 %v5233_v32, %v2181_v0  ;;  %v5235_v13 = vrot.slane %v5234_v49, 2  ;;  %v2360_v50 = vrot.slane %v2234_v51, 2 }
 0x220   : > { %v2362_v61 = vrot.slane %v2235_v54, 2  ;;  %v2353_v40 = vsel %vm1074_vm4, %v2350_v4, %v2352_v45  ;;  %v2456_v25 = vmul.f32 0.2, %v2424_v62 }
 0x221   : > { %v2351_v28 = vsel %vm1074_vm4, %v5235_v13, %v2350_v4  ;;  %v2457_v9 = vmul.f32 0.2, %v2425_v2  ;;  %v2361_v27 = vsel %vm1074_vm4, %v2359_v34, %v2360_v50  ;;  %v2423_v11 = vadd.f32 %v2353_v40, %v2179_v42 }
 0x222   : > { %v2422_v55 = vadd.f32 %v2351_v28, %v2178_v19  ;;  %v2363_v10 = vsel %vm1074_vm4, %v2360_v50, %v2362_v61  ;;  %v2426_v17 = vadd.f32 %v2361_v27, %v2182_v12  ;;  %v2488_v63 = vmax.f32 %v2424_v62, %v2456_v25 }
 0x223   : > { %v2427_v38 = vadd.f32 %v2363_v10, %v2183_v33  ;;  %v2455_v1 = vmul.f32 0.2, %v2423_v11  ;;  %v2489_v7 = vmax.f32 %v2425_v2, %v2457_v9 }
 0x224   : > { %v2454_v59 = vmul.f32 0.2, %v2422_v55  ;;  %v2458_v20 = vmul.f32 0.2, %v2426_v17  ;;  %v2816_v24 = vpack.c.bf16 %v2488_v63, %v2488_v63 }
 0x225   : > { %v2459_v39 = vmul.f32 0.2, %v2427_v38  ;;  %v2487_v18 = vmax.f32 %v2423_v11, %v2455_v1  ;;  %v2817_v21 = vpack.c.bf16 %v2489_v7, %v2489_v7 }
 0x226   : > { %v2486_v23 = vmax.f32 %v2422_v55, %v2454_v59  ;;  %v2490_v30 = vmax.f32 %v2426_v17, %v2458_v20  ;;  %2649 = vst.msk [vmem:[%s3466_s5 + $0x70] sm:$0xf] %vm2620_vm5, %v2816_v24 }
 0x227   : > { %v2491_v35 = vmax.f32 %v2427_v38, %v2459_v39  ;;  %v2815_v5 = vpack.c.bf16 %v2487_v18, %v2487_v18  ;;  %2650 = vst.msk [vmem:[%s3466_s5 + $0x74] sm:$0xf] %vm2620_vm5, %v2817_v21 }
 0x228   : > { %v2814_v58 = vpack.c.bf16 %v2486_v23, %v2486_v23  ;;  %v2818_v56 = vpack.c.bf16 %v2490_v30, %v2490_v30 }
 0x229   : > { %v2819_v37 = vpack.c.bf16 %v2491_v35, %v2491_v35  ;;  %2648 = vst.msk [vmem:[%s3466_s5 + $0x6c] sm:$0xf] %vm2620_vm5, %v2815_v5 }
 0x22a   : > { %2647 = vst.msk [vmem:[%s3466_s5 + $0x68] sm:$0xf] %vm2620_vm5, %v2814_v58  ;;  %2651 = vst.msk [vmem:[%s3466_s5 + $0x78] sm:$0xf] %vm2620_vm5, %v2818_v56 }
 0x22b   : > { %2652 = vst.msk [vmem:[%s3466_s5 + $0x7c] sm:$0xf] %vm2620_vm5, %v2819_v37 }
 0x22c PF: > { %s14_s15 = sadd.s32 1, %s2909_s15  }
 0x22d   : > { %p11_p4 = scmp.ge.s32.totalorder %s14_s15, 4  }
 0x22f   :  { %13 = sbr.rel (!%p11_p4) target bundleno = 1 (0x1), region = 69 }

</bundles_post_ra>
